<compile_context>
chip_gen: v6e
topology: v6e:2x2x1
jax: 0.10.0
libtpu: 0.0.40
codegen_flags: <defaults>
</compile_context>

<pallas_src>
import math
import functools

import jax
import jax.numpy as jnp
from jax.experimental import pallas as pl
from jax.experimental.pallas import tpu as pltpu


# ---------------------------------------------------------------------------
# small helpers (f32 math)
# ---------------------------------------------------------------------------
def _layer_norm(x, gamma, beta, eps):
    # PyTorch LayerNorm: biased variance over the last dim.
    mean = jnp.mean(x, axis=-1, keepdims=True)
    var = jnp.mean((x - mean) ** 2, axis=-1, keepdims=True)
    inv = jax.lax.rsqrt(var + eps)
    return (x - mean) * inv * gamma + beta


def _gelu_exact(x):
    # torch.nn.GELU default ("gelu" activation in DistilBERT): exact erf form.
    return 0.5 * x * (1.0 + jax.lax.erf(x * (1.0 / math.sqrt(2.0))))


def _gelu_tanh(x):
    # optional EUP-friendly tanh approximation (off by default to match PyTorch).
    c = math.sqrt(2.0 / math.pi)
    return 0.5 * x * (1.0 + jnp.tanh(c * (x + 0.044715 * x * x * x)))


def _swap_leading(x, eq):
    """(a, b, d) <-> (b, a, d) relayout; prefer the lane-layout-aware einshape."""
    try:
        return pltpu.einshape(eq, x)
    except Exception:
        return jnp.swapaxes(x, 0, 1)


@functools.lru_cache(maxsize=None)
def _pick_vmem_limit():
    """~75% of physical VMEM per core (48 MiB on v7x, 96 MiB on v5e/v6e)."""
    try:
        info = pltpu.get_tpu_info()
        cap = getattr(info, "vmem_capacity_bytes", None)
        if cap:
            return int(cap) * 3 // 4
    except Exception:
        pass
    return None  # fall back to the compiler default


# ---------------------------------------------------------------------------
# Pallas kernel: one TransformerBlock, one (batch, query-tile) per grid step
# ---------------------------------------------------------------------------
def transformer_block_kernel(
    x_ref, mask_ref,
    wqkv_ref, bqkv_ref, wo_ref, bo_ref,
    ln1_g_ref, ln1_b_ref,
    w1_ref, b1_ref, w2_ref, b2_ref,
    ln2_g_ref, ln2_b_ref,
    out_ref,
    *scratch,                       # optional (2, S, D) K/V cache (only when tq < S)
    n_heads: int, ffn_chunk, gelu_approx: bool,
):
    f32 = jnp.float32
    cdt = wqkv_ref.dtype                         # matmul compute dtype (bf16)
    gelu = _gelu_tanh if gelu_approx else _gelu_exact

    S, D = x_ref.shape[1], x_ref.shape[2]        # full sequence / model dim
    tq = out_ref.shape[1]                        # query-tile rows
    dh = D // n_heads
    full_seq = (tq == S)
    neg_inf = jnp.finfo(f32).min

    # Key-padding predicate, computed ONCE, broadcast over heads / query rows.
    key_is_pad = (mask_ref[0] == 0.0)[None]      # (1, 1, S) bool

    if full_seq:
        # ---- single fused QKV matmul over the full sequence (scale folded into Wq) ----
        xq = x_ref[0]                                            # (S, D)
        qkv = (jnp.dot(xq.astype(cdt), wqkv_ref[...],
                       preferred_element_type=f32) + bqkv_ref[...])
        q = qkv[:, :D]
        k_c = qkv[:, D:2 * D].astype(cdt)
        v_c = qkv[:, 2 * D:].astype(cdt)
    else:
        # ---- K/V projected once per batch element, cached in VMEM across q tiles ----
        qi = pl.program_id(1)
        kv_ref = scratch[0]

        @pl.when(qi == 0)
        def _():
            kv = (jnp.dot(x_ref[0].astype(cdt), wqkv_ref[:, D:],
                          preferred_element_type=f32) + bqkv_ref[:, D:])
            kv_ref[0] = kv[:, :D].astype(cdt)
            kv_ref[1] = kv[:, D:].astype(cdt)

        i0 = pl.multiple_of(qi * tq, tq)
        xq = x_ref[0, pl.ds(i0, tq), :]                          # (tq, D)
        q = (jnp.dot(xq.astype(cdt), wqkv_ref[:, :D],
                     preferred_element_type=f32) + bqkv_ref[:, :D])
        k_c = kv_ref[0]
        v_c = kv_ref[1]

    xq_f = xq.astype(f32)                                        # residual in f32

    # ---- head split: (rows, D) -> (H, rows, dh) with one relayout per tensor ----
    qh = _swap_leading(q.astype(cdt).reshape(tq, n_heads, dh), "qhd->hqd")
    kh = _swap_leading(k_c.reshape(S, n_heads, dh), "khd->hkd")
    vh = _swap_leading(v_c.reshape(S, n_heads, dh), "khd->hkd")

    # ---- batched attention (one dot_general for scores, one for p@v) ----
    scores = jnp.einsum('hqd,hkd->hqk', qh, kh,
                        preferred_element_type=f32)              # (H, tq, S) f32
    scores = jnp.where(key_is_pad, neg_inf, scores)
    scores = scores - jnp.max(scores, axis=-1, keepdims=True)
    p = jnp.exp(scores)
    # NOTE: approx reciprocal (EUP) ~2^-12 rel. error vs exact torch softmax.
    p = p * pl.reciprocal(jnp.sum(p, axis=-1, keepdims=True), approx=True)
    ctx = jnp.einsum('hqk,hkd->hqd', p.astype(cdt), vh,
                     preferred_element_type=f32)                 # (H, tq, dh) f32

    # ---- regroup heads with ONE relayout, straight into the out-projection ----
    ctx2d = _swap_leading(ctx.astype(cdt), "hqd->qhd").reshape(tq, D)
    sa = jnp.dot(ctx2d, wo_ref[...], preferred_element_type=f32) + bo_ref[...]

    # ---- residual + LayerNorm (f32, eps = 1e-12) ----
    h1 = _layer_norm(sa + xq_f, ln1_g_ref[...], ln1_b_ref[...], 1e-12)

    # ---- FFN: lin1 -> GELU -> lin2 (unchunked by default) ----
    h1_c = h1.astype(cdt)
    Hff = w1_ref.shape[1]
    if ffn_chunk is None or ffn_chunk >= Hff:
        hid = jnp.dot(h1_c, w1_ref[...], preferred_element_type=f32) + b1_ref[...]
        hid = gelu(hid)
        ff = jnp.dot(hid.astype(cdt), w2_ref[...],
                     preferred_element_type=f32) + b2_ref[...]
    else:
        ff = jnp.zeros((tq, D), f32)
        for c0 in range(0, Hff, ffn_chunk):
            c1 = min(c0 + ffn_chunk, Hff)
            hcol = (jnp.dot(h1_c, w1_ref[:, c0:c1], preferred_element_type=f32)
                    + b1_ref[:, c0:c1])
            hcol = gelu(hcol)
            ff = ff + jnp.dot(hcol.astype(cdt), w2_ref[c0:c1, :],
                              preferred_element_type=f32)
        ff = ff + b2_ref[...]

    # ---- residual + LayerNorm ----
    h2 = _layer_norm(ff + h1, ln2_g_ref[...], ln2_b_ref[...], 1e-12)
    out_ref[0] = h2.astype(out_ref.dtype)


# ---------------------------------------------------------------------------
# Wrapper: one pallas_call per TransformerBlock
# ---------------------------------------------------------------------------
def transformer_block(x, mask3, p, *, n_heads, q_tile=512, ffn_chunk=None,
                      gelu_approx=False, out_dtype=None):
    bs, S, D = x.shape
    Hff = p["w1"].shape[1]
    cdt = p["wqkv"].dtype
    out_dtype = x.dtype if out_dtype is None else out_dtype

    # Prefer the full-sequence tile (fused QKV, no KV recompute); only tile the query
    # axis for long sequences, and only when it divides evenly (no ragged tail).
    if S <= q_tile or S % q_tile != 0:
        tq = S
    else:
        tq = q_tile
    n_qt = S // tq

    w2d = lambda b, qi: (0, 0)
    x_spec = pl.BlockSpec((1, S, D), lambda b, qi: (b, 0, 0))     # x passed once
    m_spec = pl.BlockSpec((1, 1, S), lambda b, qi: (b, 0, 0))
    o_spec = pl.BlockSpec((1, tq, D), lambda b, qi: (b, qi, 0))

    in_specs = [
        x_spec, m_spec,
        pl.BlockSpec((D, 3 * D), w2d), pl.BlockSpec((1, 3 * D), w2d),   # wqkv, bqkv
        pl.BlockSpec((D, D), w2d), pl.BlockSpec((1, D), w2d),           # wo, bo
        pl.BlockSpec((1, D), w2d), pl.BlockSpec((1, D), w2d),           # ln1 g, b
        pl.BlockSpec((D, Hff), w2d), pl.BlockSpec((1, Hff), w2d),       # w1, b1
        pl.BlockSpec((Hff, D), w2d), pl.BlockSpec((1, D), w2d),         # w2, b2
        pl.BlockSpec((1, D), w2d), pl.BlockSpec((1, D), w2d),           # ln2 g, b
    ]

    # K/V cache scratch only needed when the query axis is tiled.
    scratch_shapes = [] if tq == S else [pltpu.VMEM((2, S, D), cdt)]

    kernel = functools.partial(transformer_block_kernel, n_heads=n_heads,
                               ffn_chunk=ffn_chunk, gelu_approx=gelu_approx)

    # Advisory cost estimate: QKV + out-proj + 2 FFN matmuls + QK^T + PV.
    flops = int(bs * (2 * S * D * (4 * D + 2 * Hff) + 4 * S * S * D))
    transcendentals = int(bs * (n_heads * S * S + S * Hff))
    wbytes = jnp.dtype(cdt).itemsize
    bytes_accessed = int(bs * S * D * (jnp.dtype(x.dtype).itemsize
                                       + jnp.dtype(out_dtype).itemsize)
                         + bs * S * 4
                         + (4 * D * D + 2 * D * Hff) * wbytes
                         + (6 * D + 2 * Hff) * 4)

    return pl.pallas_call(
        kernel,
        out_shape=jax.ShapeDtypeStruct((bs, S, D), out_dtype),
        grid_spec=pltpu.PrefetchScalarGridSpec(
            num_scalar_prefetch=0,
            grid=(bs, n_qt),
            in_specs=in_specs,
            out_specs=o_spec,
            scratch_shapes=scratch_shapes,
        ),
        compiler_params=pltpu.CompilerParams(
            # qi axis is "arbitrary" so the per-batch K/V scratch is reused sequentially.
            dimension_semantics=("parallel", "arbitrary"),
            vmem_limit_bytes=_pick_vmem_limit(),
        ),
        cost_estimate=pl.CostEstimate(
            flops=flops,
            transcendentals=transcendentals,
            bytes_accessed=bytes_accessed),
    )(
        x, mask3,
        p["wqkv"], p["bqkv"], p["wo"], p["bo"],
        p["ln1_g"], p["ln1_b"],
        p["w1"], p["b1"], p["w2"], p["b2"],
        p["ln2_g"], p["ln2_b"],
    )


# ---------------------------------------------------------------------------
# One-time parameter preparation (hoisted OUT of the jitted forward)
# ---------------------------------------------------------------------------
def prepare_layer_params(p, *, n_heads, param_dtype=jnp.bfloat16):
    """Fuse Wq/Wk/Wv, fold 1/sqrt(dh) into the Q columns, cast matmul weights to bf16.
    Biases and LayerNorm parameters stay f32 (added to f32 accumulators)."""
    f32 = jnp.float32
    dim = p["wq"].shape[0]
    scale = 1.0 / math.sqrt(dim // n_heads)
    wqkv = jnp.concatenate([p["wq"] * scale, p["wk"], p["wv"]], axis=1)
    bqkv = jnp.concatenate([p["bq"] * scale, p["bk"], p["bv"]], axis=1)
    return {
        "wqkv": wqkv.astype(param_dtype), "bqkv": bqkv.astype(f32),
        "wo": p["wo"].astype(param_dtype), "bo": p["bo"].astype(f32),
        "ln1_g": p["ln1_g"].astype(f32), "ln1_b": p["ln1_b"].astype(f32),
        "w1": p["w1"].astype(param_dtype), "b1": p["b1"].astype(f32),
        "w2": p["w2"].astype(param_dtype), "b2": p["b2"].astype(f32),
        "ln2_g": p["ln2_g"].astype(f32), "ln2_b": p["ln2_b"].astype(f32),
    }


def prepare_transformer_params(layer_params, *, n_heads, param_dtype=jnp.bfloat16):
    return [prepare_layer_params(p, n_heads=n_heads, param_dtype=param_dtype)
            for p in layer_params]


# ---------------------------------------------------------------------------
# Transformer.forward equivalent
# ---------------------------------------------------------------------------
def distilbert_transformer(x, attn_mask, dev_layer_params, *, n_heads,
                           q_tile=512, ffn_chunk=None, gelu_approx=False,
                           activation_dtype=jnp.bfloat16):
    """Equivalent of Transformer.forward(x, attn_mask) with default flags.

    x:         (bs, seq, dim)
    attn_mask: (bs, seq)  1.0 = keep, 0.0 = masked
    Returns (last_hidden_state,), matching return_dict=False.
    """
    # TODO(synk): output_hidden_states / output_attentions variants are not emitted
    # (defaults False in the reference forward); dropout is identity (eval mode).
    mask3 = attn_mask.reshape(attn_mask.shape[0], 1,
                              attn_mask.shape[1]).astype(jnp.float32)
    n_layers = len(dev_layer_params)
    hidden = x
    for i, p in enumerate(dev_layer_params):
        # inter-layer activations in bf16 (halves HBM traffic); last layer in x.dtype
        out_dtype = x.dtype if i == n_layers - 1 else activation_dtype
        hidden = transformer_block(hidden, mask3, p, n_heads=n_heads,
                                   q_tile=q_tile, ffn_chunk=ffn_chunk,
                                   gelu_approx=gelu_approx, out_dtype=out_dtype)
    return (hidden,)


# ---------------------------------------------------------------------------
# Deterministic parameter construction
# ---------------------------------------------------------------------------
def init_layer_params(key, dim, hidden_dim):
    ks = jax.random.split(key, 6)
    std = 0.02
    return {
        "wq": jax.random.normal(ks[0], (dim, dim), jnp.float32) * std,
        "bq": jnp.zeros((1, dim), jnp.float32),
        "wk": jax.random.normal(ks[1], (dim, dim), jnp.float32) * std,
        "bk": jnp.zeros((1, dim), jnp.float32),
        "wv": jax.random.normal(ks[2], (dim, dim), jnp.float32) * std,
        "bv": jnp.zeros((1, dim), jnp.float32),
        "wo": jax.random.normal(ks[3], (dim, dim), jnp.float32) * std,
        "bo": jnp.zeros((1, dim), jnp.float32),
        "ln1_g": jnp.ones((1, dim), jnp.float32),
        "ln1_b": jnp.zeros((1, dim), jnp.float32),
        "w1": jax.random.normal(ks[4], (dim, hidden_dim), jnp.float32) * std,
        "b1": jnp.zeros((1, hidden_dim), jnp.float32),
        "w2": jax.random.normal(ks[5], (hidden_dim, dim), jnp.float32) * std,
        "b2": jnp.zeros((1, dim), jnp.float32),
        "ln2_g": jnp.ones((1, dim), jnp.float32),
        "ln2_b": jnp.zeros((1, dim), jnp.float32),
    }


if __name__ == "__main__":
    # Small DistilBERT-like config
    bs, seq, dim, n_heads, hidden_dim, n_layers = 2, 8, 32, 4, 64, 2

    key = jax.random.PRNGKey(0)
    kx, *layer_keys = jax.random.split(key, n_layers + 1)

    x = jax.random.normal(kx, (bs, seq, dim), jnp.float32)
    # attention mask: last 2 tokens of batch element 1 are padding
    attn_mask = jnp.ones((bs, seq), jnp.float32)
    attn_mask = attn_mask.at[1, -2:].set(0.0)

    layer_params = [init_layer_params(layer_keys[i], dim, hidden_dim)
                    for i in range(n_layers)]

    # weight fusion / Q-scale fold / bf16 cast done ONCE, outside the jitted forward
    dev_params = prepare_transformer_params(layer_params, n_heads=n_heads)

    fwd = jax.jit(functools.partial(distilbert_transformer, n_heads=n_heads))
    (hidden_state,) = fwd(x, attn_mask, dev_params)
    jax.block_until_ready(hidden_state)
    assert hidden_state.shape == (bs, seq, dim)
    assert hidden_state.dtype == x.dtype
    assert bool(jnp.all(jnp.isfinite(hidden_state)))
    print("KERNEL_OK")
</pallas_src>

<mosaic_0001>
module attributes {stable_mosaic.version = 11 : i64} {
  func.func @transformer_block_kernel(%arg0: i32, %arg1: i32, %arg2: memref<1x8x32xf32, #tpu.memory_space<vmem>>, %arg3: memref<1x1x8xf32, #tpu.memory_space<vmem>>, %arg4: memref<32x96xbf16, #tpu.memory_space<vmem>>, %arg5: memref<1x96xf32, #tpu.memory_space<vmem>>, %arg6: memref<32x32xbf16, #tpu.memory_space<vmem>>, %arg7: memref<1x32xf32, #tpu.memory_space<vmem>>, %arg8: memref<1x32xf32, #tpu.memory_space<vmem>>, %arg9: memref<1x32xf32, #tpu.memory_space<vmem>>, %arg10: memref<32x64xbf16, #tpu.memory_space<vmem>>, %arg11: memref<1x64xf32, #tpu.memory_space<vmem>>, %arg12: memref<64x32xbf16, #tpu.memory_space<vmem>>, %arg13: memref<1x32xf32, #tpu.memory_space<vmem>>, %arg14: memref<1x32xf32, #tpu.memory_space<vmem>>, %arg15: memref<1x32xf32, #tpu.memory_space<vmem>>, %arg16: memref<1x8x32xbf16, #tpu.memory_space<vmem>>) attributes {dimension_semantics = [#tpu.dimension_semantics<parallel>, #tpu.dimension_semantics<arbitrary>], iteration_bounds = array<i64: 2, 1>, scalar_prefetch = 0 : i64, scratch_operands = 0 : i64, tpu.core_type = #tpu.core_type<tc>, window_params = [{transform_indices = @transform_0, window_bounds = array<i64: 1, 8, 32>}, {transform_indices = @transform_1, window_bounds = array<i64: 1, 1, 8>}, {pipeline_mode = #tpu.pipeline_mode<synchronous>, transform_indices = @transform_2, window_bounds = array<i64: 32, 96>}, {pipeline_mode = #tpu.pipeline_mode<synchronous>, transform_indices = @transform_3, window_bounds = array<i64: 1, 96>}, {pipeline_mode = #tpu.pipeline_mode<synchronous>, transform_indices = @transform_4, window_bounds = array<i64: 32, 32>}, {pipeline_mode = #tpu.pipeline_mode<synchronous>, transform_indices = @transform_5, window_bounds = array<i64: 1, 32>}, {pipeline_mode = #tpu.pipeline_mode<synchronous>, transform_indices = @transform_6, window_bounds = array<i64: 1, 32>}, {pipeline_mode = #tpu.pipeline_mode<synchronous>, transform_indices = @transform_7, window_bounds = array<i64: 1, 32>}, {pipeline_mode = #tpu.pipeline_mode<synchronous>, transform_indices = @transform_8, window_bounds = array<i64: 32, 64>}, {pipeline_mode = #tpu.pipeline_mode<synchronous>, transform_indices = @transform_9, window_bounds = array<i64: 1, 64>}, {pipeline_mode = #tpu.pipeline_mode<synchronous>, transform_indices = @transform_10, window_bounds = array<i64: 64, 32>}, {pipeline_mode = #tpu.pipeline_mode<synchronous>, transform_indices = @transform_11, window_bounds = array<i64: 1, 32>}, {pipeline_mode = #tpu.pipeline_mode<synchronous>, transform_indices = @transform_12, window_bounds = array<i64: 1, 32>}, {pipeline_mode = #tpu.pipeline_mode<synchronous>, transform_indices = @transform_13, window_bounds = array<i64: 1, 32>}, {transform_indices = @transform_14, window_bounds = array<i64: 1, 8, 32>}]} {
    %c0 = arith.constant 0 : index
    %c0_0 = arith.constant 0 : index
    %c0_1 = arith.constant 0 : index
    %0 = vector.load %arg3[%c0, %c0_0, %c0_1] : memref<1x1x8xf32, #tpu.memory_space<vmem>>, vector<1x1x8xf32>
    %1 = vector.shape_cast %0 : vector<1x1x8xf32> to vector<1x8xf32>
    %cst = arith.constant 0.000000e+00 : f32
    %2 = vector.broadcast %cst : f32 to vector<1x8xf32>
    %3 = arith.cmpf oeq, %1, %2 : vector<1x8xf32>
    %4 = vector.shape_cast %3 : vector<1x8xi1> to vector<1x1x8xi1>
    %c0_2 = arith.constant 0 : index
    %c0_3 = arith.constant 0 : index
    %c0_4 = arith.constant 0 : index
    %5 = vector.load %arg2[%c0_2, %c0_3, %c0_4] : memref<1x8x32xf32, #tpu.memory_space<vmem>>, vector<1x8x32xf32>
    %6 = vector.shape_cast %5 : vector<1x8x32xf32> to vector<8x32xf32>
    %7 = arith.truncf %6 : vector<8x32xf32> to vector<8x32xbf16>
    %c0_5 = arith.constant 0 : index
    %c0_6 = arith.constant 0 : index
    %8 = vector.load %arg4[%c0_5, %c0_6] : memref<32x96xbf16, #tpu.memory_space<vmem>>, vector<32x96xbf16>
    %cst_7 = arith.constant dense<0.000000e+00> : vector<8x96xf32>
    %9 = tpu.matmul %7, %8, %cst_7 {dimension_numbers = #tpu.dot_dimension_numbers<[1], [0], [0], [1], [0, 0, 1, 1], [], []>} : vector<8x32xbf16>, vector<32x96xbf16>, vector<8x96xf32> -> vector<8x96xf32>
    %c0_8 = arith.constant 0 : index
    %c0_9 = arith.constant 0 : index
    %10 = vector.load %arg5[%c0_8, %c0_9] : memref<1x96xf32, #tpu.memory_space<vmem>>, vector<1x96xf32>
    %11 = vector.broadcast %10 : vector<1x96xf32> to vector<8x96xf32>
    %12 = arith.addf %9, %11 : vector<8x96xf32>
    %13 = vector.extract_strided_slice %12 {offsets = [0, 0], sizes = [8, 32], strides = [1, 1]} : vector<8x96xf32> to vector<8x32xf32>
    %14 = vector.extract_strided_slice %12 {offsets = [0, 32], sizes = [8, 32], strides = [1, 1]} : vector<8x96xf32> to vector<8x32xf32>
    %15 = arith.truncf %14 : vector<8x32xf32> to vector<8x32xbf16>
    %16 = vector.extract_strided_slice %12 {offsets = [0, 64], sizes = [8, 32], strides = [1, 1]} : vector<8x96xf32> to vector<8x32xf32>
    %17 = arith.truncf %16 : vector<8x32xf32> to vector<8x32xbf16>
    %18 = arith.truncf %13 : vector<8x32xf32> to vector<8x32xbf16>
    %19 = vector.shape_cast %18 : vector<8x32xbf16> to vector<8x4x8xbf16>
    %20 = tpu.transpose %19, [1, 0, 2] : vector<8x4x8xbf16> -> vector<4x8x8xbf16>
    %21 = vector.shape_cast %15 : vector<8x32xbf16> to vector<8x4x8xbf16>
    %22 = tpu.transpose %21, [1, 0, 2] : vector<8x4x8xbf16> -> vector<4x8x8xbf16>
    %23 = vector.shape_cast %17 : vector<8x32xbf16> to vector<8x4x8xbf16>
    %24 = tpu.transpose %23, [1, 0, 2] : vector<8x4x8xbf16> -> vector<4x8x8xbf16>
    "tpu.trace_start"() <{level = 10 : i32, message = "hqd,hkd->hqk"}> : () -> ()
    %cst_10 = arith.constant dense<0.000000e+00> : vector<4x8x8xf32>
    %25 = tpu.matmul %20, %22, %cst_10 {dimension_numbers = #tpu.dot_dimension_numbers<[2], [2], [1], [1], [0, 0, 0, 1, 1, 1], [0], [0]>} : vector<4x8x8xbf16>, vector<4x8x8xbf16>, vector<4x8x8xf32> -> vector<4x8x8xf32>
    %cst_11 = arith.constant -3.40282347E+38 : f32
    "tpu.trace_stop"() : () -> ()
    %26 = vector.shape_cast %4 : vector<1x1x8xi1> to vector<1x1x8xi1>
    %27 = vector.broadcast %26 : vector<1x1x8xi1> to vector<4x8x8xi1>
    %28 = vector.broadcast %cst_11 : f32 to vector<4x8x8xf32>
    %29 = arith.select %27, %28, %25 : vector<4x8x8xi1>, vector<4x8x8xf32>
    %cst_12 = arith.constant dense<0xFF800000> : vector<4x8xf32>
    %30 = vector.multi_reduction <maximumf>, %29, %cst_12 [2] : vector<4x8x8xf32> to vector<4x8xf32>
    %31 = vector.shape_cast %30 : vector<4x8xf32> to vector<4x8x1xf32>
    %32 = vector.broadcast %31 : vector<4x8x1xf32> to vector<4x8x8xf32>
    %33 = arith.subf %29, %32 : vector<4x8x8xf32>
    %34 = math.exp %33 : vector<4x8x8xf32>
    %cst_13 = arith.constant dense<0.000000e+00> : vector<4x8xf32>
    %35 = vector.multi_reduction <add>, %34, %cst_13 [2] : vector<4x8x8xf32> to vector<4x8xf32>
    %36 = vector.shape_cast %35 : vector<4x8xf32> to vector<4x8x1xf32>
    %37 = tpu.reciprocal %36 {approx = true} : vector<4x8x1xf32> -> vector<4x8x1xf32>
    %38 = vector.broadcast %37 : vector<4x8x1xf32> to vector<4x8x8xf32>
    %39 = arith.mulf %34, %38 : vector<4x8x8xf32>
    %40 = arith.truncf %39 : vector<4x8x8xf32> to vector<4x8x8xbf16>
    "tpu.trace_start"() <{level = 10 : i32, message = "hqk,hkd->hqd"}> : () -> ()
    %cst_14 = arith.constant dense<0.000000e+00> : vector<4x8x8xf32>
    %41 = tpu.matmul %40, %24, %cst_14 {dimension_numbers = #tpu.dot_dimension_numbers<[2], [1], [1], [2], [0, 0, 0, 1, 1, 2], [0], [0]>} : vector<4x8x8xbf16>, vector<4x8x8xbf16>, vector<4x8x8xf32> -> vector<4x8x8xf32>
    "tpu.trace_stop"() : () -> ()
    %42 = arith.truncf %41 : vector<4x8x8xf32> to vector<4x8x8xbf16>
    %43 = tpu.transpose %42, [1, 0, 2] : vector<4x8x8xbf16> -> vector<8x4x8xbf16>
    %44 = vector.shape_cast %43 : vector<8x4x8xbf16> to vector<8x32xbf16>
    %c0_15 = arith.constant 0 : index
    %c0_16 = arith.constant 0 : index
    %45 = vector.load %arg6[%c0_15, %c0_16] : memref<32x32xbf16, #tpu.memory_space<vmem>>, vector<32x32xbf16>
    %cst_17 = arith.constant dense<0.000000e+00> : vector<8x32xf32>
    %46 = tpu.matmul %44, %45, %cst_17 {dimension_numbers = #tpu.dot_dimension_numbers<[1], [0], [0], [1], [0, 0, 1, 1], [], []>} : vector<8x32xbf16>, vector<32x32xbf16>, vector<8x32xf32> -> vector<8x32xf32>
    %c0_18 = arith.constant 0 : index
    %c0_19 = arith.constant 0 : index
    %47 = vector.load %arg7[%c0_18, %c0_19] : memref<1x32xf32, #tpu.memory_space<vmem>>, vector<1x32xf32>
    %48 = vector.broadcast %47 : vector<1x32xf32> to vector<8x32xf32>
    %49 = arith.addf %46, %48 : vector<8x32xf32>
    %50 = arith.addf %49, %6 : vector<8x32xf32>
    %c0_20 = arith.constant 0 : index
    %c0_21 = arith.constant 0 : index
    %51 = vector.load %arg8[%c0_20, %c0_21] : memref<1x32xf32, #tpu.memory_space<vmem>>, vector<1x32xf32>
    %c0_22 = arith.constant 0 : index
    %c0_23 = arith.constant 0 : index
    %52 = vector.load %arg9[%c0_22, %c0_23] : memref<1x32xf32, #tpu.memory_space<vmem>>, vector<1x32xf32>
    %cst_24 = arith.constant dense<0.000000e+00> : vector<8xf32>
    %53 = vector.multi_reduction <add>, %50, %cst_24 [1] : vector<8x32xf32> to vector<8xf32>
    %54 = vector.shape_cast %53 : vector<8xf32> to vector<8x1xf32>
    %cst_25 = arith.constant 3.200000e+01 : f32
    %55 = vector.broadcast %cst_25 : f32 to vector<8x1xf32>
    %56 = arith.divf %54, %55 : vector<8x1xf32>
    %57 = vector.broadcast %56 : vector<8x1xf32> to vector<8x32xf32>
    %58 = arith.subf %50, %57 : vector<8x32xf32>
    %59 = arith.mulf %58, %58 : vector<8x32xf32>
    %cst_26 = arith.constant dense<0.000000e+00> : vector<8xf32>
    %60 = vector.multi_reduction <add>, %59, %cst_26 [1] : vector<8x32xf32> to vector<8xf32>
    %61 = vector.shape_cast %60 : vector<8xf32> to vector<8x1xf32>
    %cst_27 = arith.constant 3.200000e+01 : f32
    %62 = vector.broadcast %cst_27 : f32 to vector<8x1xf32>
    %63 = arith.divf %61, %62 : vector<8x1xf32>
    %cst_28 = arith.constant 9.99999996E-13 : f32
    %64 = vector.broadcast %cst_28 : f32 to vector<8x1xf32>
    %65 = arith.addf %63, %64 : vector<8x1xf32>
    %66 = math.rsqrt %65 : vector<8x1xf32>
    %67 = vector.broadcast %56 : vector<8x1xf32> to vector<8x32xf32>
    %68 = arith.subf %50, %67 : vector<8x32xf32>
    %69 = vector.broadcast %66 : vector<8x1xf32> to vector<8x32xf32>
    %70 = arith.mulf %68, %69 : vector<8x32xf32>
    %71 = vector.broadcast %51 : vector<1x32xf32> to vector<8x32xf32>
    %72 = arith.mulf %70, %71 : vector<8x32xf32>
    %73 = vector.broadcast %52 : vector<1x32xf32> to vector<8x32xf32>
    %74 = arith.addf %72, %73 : vector<8x32xf32>
    %75 = arith.truncf %74 : vector<8x32xf32> to vector<8x32xbf16>
    %c0_29 = arith.constant 0 : index
    %c0_30 = arith.constant 0 : index
    %76 = vector.load %arg10[%c0_29, %c0_30] : memref<32x64xbf16, #tpu.memory_space<vmem>>, vector<32x64xbf16>
    %cst_31 = arith.constant dense<0.000000e+00> : vector<8x64xf32>
    %77 = tpu.matmul %75, %76, %cst_31 {dimension_numbers = #tpu.dot_dimension_numbers<[1], [0], [0], [1], [0, 0, 1, 1], [], []>} : vector<8x32xbf16>, vector<32x64xbf16>, vector<8x64xf32> -> vector<8x64xf32>
    %c0_32 = arith.constant 0 : index
    %c0_33 = arith.constant 0 : index
    %78 = vector.load %arg11[%c0_32, %c0_33] : memref<1x64xf32, #tpu.memory_space<vmem>>, vector<1x64xf32>
    %79 = vector.broadcast %78 : vector<1x64xf32> to vector<8x64xf32>
    %80 = arith.addf %77, %79 : vector<8x64xf32>
    %cst_34 = arith.constant 5.000000e-01 : f32
    %81 = vector.broadcast %cst_34 : f32 to vector<8x64xf32>
    %82 = arith.mulf %81, %80 : vector<8x64xf32>
    %cst_35 = arith.constant 0.707106769 : f32
    %83 = vector.broadcast %cst_35 : f32 to vector<8x64xf32>
    %84 = arith.mulf %80, %83 : vector<8x64xf32>
    %85 = math.erf %84 : vector<8x64xf32>
    %cst_36 = arith.constant 1.000000e+00 : f32
    %86 = vector.broadcast %cst_36 : f32 to vector<8x64xf32>
    %87 = arith.addf %86, %85 : vector<8x64xf32>
    %88 = arith.mulf %82, %87 : vector<8x64xf32>
    %89 = arith.truncf %88 : vector<8x64xf32> to vector<8x64xbf16>
    %c0_37 = arith.constant 0 : index
    %c0_38 = arith.constant 0 : index
    %90 = vector.load %arg12[%c0_37, %c0_38] : memref<64x32xbf16, #tpu.memory_space<vmem>>, vector<64x32xbf16>
    %cst_39 = arith.constant dense<0.000000e+00> : vector<8x32xf32>
    %91 = tpu.matmul %89, %90, %cst_39 {dimension_numbers = #tpu.dot_dimension_numbers<[1], [0], [0], [1], [0, 0, 1, 1], [], []>} : vector<8x64xbf16>, vector<64x32xbf16>, vector<8x32xf32> -> vector<8x32xf32>
    %c0_40 = arith.constant 0 : index
    %c0_41 = arith.constant 0 : index
    %92 = vector.load %arg13[%c0_40, %c0_41] : memref<1x32xf32, #tpu.memory_space<vmem>>, vector<1x32xf32>
    %93 = vector.broadcast %92 : vector<1x32xf32> to vector<8x32xf32>
    %94 = arith.addf %91, %93 : vector<8x32xf32>
    %95 = arith.addf %94, %74 : vector<8x32xf32>
    %c0_42 = arith.constant 0 : index
    %c0_43 = arith.constant 0 : index
    %96 = vector.load %arg14[%c0_42, %c0_43] : memref<1x32xf32, #tpu.memory_space<vmem>>, vector<1x32xf32>
    %c0_44 = arith.constant 0 : index
    %c0_45 = arith.constant 0 : index
    %97 = vector.load %arg15[%c0_44, %c0_45] : memref<1x32xf32, #tpu.memory_space<vmem>>, vector<1x32xf32>
    %cst_46 = arith.constant dense<0.000000e+00> : vector<8xf32>
    %98 = vector.multi_reduction <add>, %95, %cst_46 [1] : vector<8x32xf32> to vector<8xf32>
    %99 = vector.shape_cast %98 : vector<8xf32> to vector<8x1xf32>
    %cst_47 = arith.constant 3.200000e+01 : f32
    %100 = vector.broadcast %cst_47 : f32 to vector<8x1xf32>
    %101 = arith.divf %99, %100 : vector<8x1xf32>
    %102 = vector.broadcast %101 : vector<8x1xf32> to vector<8x32xf32>
    %103 = arith.subf %95, %102 : vector<8x32xf32>
    %104 = arith.mulf %103, %103 : vector<8x32xf32>
    %cst_48 = arith.constant dense<0.000000e+00> : vector<8xf32>
    %105 = vector.multi_reduction <add>, %104, %cst_48 [1] : vector<8x32xf32> to vector<8xf32>
    %106 = vector.shape_cast %105 : vector<8xf32> to vector<8x1xf32>
    %cst_49 = arith.constant 3.200000e+01 : f32
    %107 = vector.broadcast %cst_49 : f32 to vector<8x1xf32>
    %108 = arith.divf %106, %107 : vector<8x1xf32>
    %cst_50 = arith.constant 9.99999996E-13 : f32
    %109 = vector.broadcast %cst_50 : f32 to vector<8x1xf32>
    %110 = arith.addf %108, %109 : vector<8x1xf32>
    %111 = math.rsqrt %110 : vector<8x1xf32>
    %112 = vector.broadcast %101 : vector<8x1xf32> to vector<8x32xf32>
    %113 = arith.subf %95, %112 : vector<8x32xf32>
    %114 = vector.broadcast %111 : vector<8x1xf32> to vector<8x32xf32>
    %115 = arith.mulf %113, %114 : vector<8x32xf32>
    %116 = vector.broadcast %96 : vector<1x32xf32> to vector<8x32xf32>
    %117 = arith.mulf %115, %116 : vector<8x32xf32>
    %118 = vector.broadcast %97 : vector<1x32xf32> to vector<8x32xf32>
    %119 = arith.addf %117, %118 : vector<8x32xf32>
    %120 = arith.truncf %119 : vector<8x32xf32> to vector<8x32xbf16>
    %c0_51 = arith.constant 0 : index
    %c0_52 = arith.constant 0 : index
    %c0_53 = arith.constant 0 : index
    %121 = vector.load %arg16[%c0_51, %c0_52, %c0_53] : memref<1x8x32xbf16, #tpu.memory_space<vmem>>, vector<1x8x32xbf16>
    %122 = vector.shape_cast %121 : vector<1x8x32xbf16> to vector<8x32xbf16>
    %123 = vector.shape_cast %120 : vector<8x32xbf16> to vector<1x8x32xbf16>
    tpu.vector_store %arg16[%c0_51, %c0_52, %c0_53], %123 {strides = array<i32>} : memref<1x8x32xbf16, #tpu.memory_space<vmem>>, vector<1x8x32xbf16>,
    return
  }
  func.func @transform_0(%arg0: i32, %arg1: i32) -> (i32, i32, i32) {
    %c0_i32 = arith.constant 0 : i32
    %c0_i32_0 = arith.constant 0 : i32
    %c0_i32_1 = arith.constant 0 : i32
    return %arg0, %c0_i32, %c0_i32_0 : i32, i32, i32
  }
  func.func @transform_1(%arg0: i32, %arg1: i32) -> (i32, i32, i32) {
    %c0_i32 = arith.constant 0 : i32
    %c0_i32_0 = arith.constant 0 : i32
    %c0_i32_1 = arith.constant 0 : i32
    return %arg0, %c0_i32, %c0_i32_0 : i32, i32, i32
  }
  func.func @transform_2(%arg0: i32, %arg1: i32) -> (i32, i32) {
    %c0_i32 = arith.constant 0 : i32
    %c0_i32_0 = arith.constant 0 : i32
    %c0_i32_1 = arith.constant 0 : i32
    return %c0_i32, %c0_i32_0 : i32, i32
  }
  func.func @transform_3(%arg0: i32, %arg1: i32) -> (i32, i32) {
    %c0_i32 = arith.constant 0 : i32
    %c0_i32_0 = arith.constant 0 : i32
    %c0_i32_1 = arith.constant 0 : i32
    return %c0_i32, %c0_i32_0 : i32, i32
  }
  func.func @transform_4(%arg0: i32, %arg1: i32) -> (i32, i32) {
    %c0_i32 = arith.constant 0 : i32
    %c0_i32_0 = arith.constant 0 : i32
    %c0_i32_1 = arith.constant 0 : i32
    return %c0_i32, %c0_i32_0 : i32, i32
  }
  func.func @transform_5(%arg0: i32, %arg1: i32) -> (i32, i32) {
    %c0_i32 = arith.constant 0 : i32
    %c0_i32_0 = arith.constant 0 : i32
    %c0_i32_1 = arith.constant 0 : i32
    return %c0_i32, %c0_i32_0 : i32, i32
  }
  func.func @transform_6(%arg0: i32, %arg1: i32) -> (i32, i32) {
    %c0_i32 = arith.constant 0 : i32
    %c0_i32_0 = arith.constant 0 : i32
    %c0_i32_1 = arith.constant 0 : i32
    return %c0_i32, %c0_i32_0 : i32, i32
  }
  func.func @transform_7(%arg0: i32, %arg1: i32) -> (i32, i32) {
    %c0_i32 = arith.constant 0 : i32
    %c0_i32_0 = arith.constant 0 : i32
    %c0_i32_1 = arith.constant 0 : i32
    return %c0_i32, %c0_i32_0 : i32, i32
  }
  func.func @transform_8(%arg0: i32, %arg1: i32) -> (i32, i32) {
    %c0_i32 = arith.constant 0 : i32
    %c0_i32_0 = arith.constant 0 : i32
    %c0_i32_1 = arith.constant 0 : i32
    return %c0_i32, %c0_i32_0 : i32, i32
  }
  func.func @transform_9(%arg0: i32, %arg1: i32) -> (i32, i32) {
    %c0_i32 = arith.constant 0 : i32
    %c0_i32_0 = arith.constant 0 : i32
    %c0_i32_1 = arith.constant 0 : i32
    return %c0_i32, %c0_i32_0 : i32, i32
  }
  func.func @transform_10(%arg0: i32, %arg1: i32) -> (i32, i32) {
    %c0_i32 = arith.constant 0 : i32
    %c0_i32_0 = arith.constant 0 : i32
    %c0_i32_1 = arith.constant 0 : i32
    return %c0_i32, %c0_i32_0 : i32, i32
  }
  func.func @transform_11(%arg0: i32, %arg1: i32) -> (i32, i32) {
    %c0_i32 = arith.constant 0 : i32
    %c0_i32_0 = arith.constant 0 : i32
    %c0_i32_1 = arith.constant 0 : i32
    return %c0_i32, %c0_i32_0 : i32, i32
  }
  func.func @transform_12(%arg0: i32, %arg1: i32) -> (i32, i32) {
    %c0_i32 = arith.constant 0 : i32
    %c0_i32_0 = arith.constant 0 : i32
    %c0_i32_1 = arith.constant 0 : i32
    return %c0_i32, %c0_i32_0 : i32, i32
  }
  func.func @transform_13(%arg0: i32, %arg1: i32) -> (i32, i32) {
    %c0_i32 = arith.constant 0 : i32
    %c0_i32_0 = arith.constant 0 : i32
    %c0_i32_1 = arith.constant 0 : i32
    return %c0_i32, %c0_i32_0 : i32, i32
  }
  func.func @transform_14(%arg0: i32, %arg1: i32) -> (i32, i32, i32) {
    %c0_i32 = arith.constant 0 : i32
    %c0_i32_0 = arith.constant 0 : i32
    return %arg0, %arg1, %c0_i32 : i32, i32, i32
  }
}

module attributes {stable_mosaic.version = 11 : i64} {
  func.func @transformer_block_kernel(%arg0: i32, %arg1: i32, %arg2: memref<1x8x32xbf16, #tpu.memory_space<vmem>>, %arg3: memref<1x1x8xf32, #tpu.memory_space<vmem>>, %arg4: memref<32x96xbf16, #tpu.memory_space<vmem>>, %arg5: memref<1x96xf32, #tpu.memory_space<vmem>>, %arg6: memref<32x32xbf16, #tpu.memory_space<vmem>>, %arg7: memref<1x32xf32, #tpu.memory_space<vmem>>, %arg8: memref<1x32xf32, #tpu.memory_space<vmem>>, %arg9: memref<1x32xf32, #tpu.memory_space<vmem>>, %arg10: memref<32x64xbf16, #tpu.memory_space<vmem>>, %arg11: memref<1x64xf32, #tpu.memory_space<vmem>>, %arg12: memref<64x32xbf16, #tpu.memory_space<vmem>>, %arg13: memref<1x32xf32, #tpu.memory_space<vmem>>, %arg14: memref<1x32xf32, #tpu.memory_space<vmem>>, %arg15: memref<1x32xf32, #tpu.memory_space<vmem>>, %arg16: memref<1x8x32xf32, #tpu.memory_space<vmem>>) attributes {dimension_semantics = [#tpu.dimension_semantics<parallel>, #tpu.dimension_semantics<arbitrary>], iteration_bounds = array<i64: 2, 1>, scalar_prefetch = 0 : i64, scratch_operands = 0 : i64, tpu.core_type = #tpu.core_type<tc>, window_params = [{transform_indices = @transform_0, window_bounds = array<i64: 1, 8, 32>}, {transform_indices = @transform_1, window_bounds = array<i64: 1, 1, 8>}, {pipeline_mode = #tpu.pipeline_mode<synchronous>, transform_indices = @transform_2, window_bounds = array<i64: 32, 96>}, {pipeline_mode = #tpu.pipeline_mode<synchronous>, transform_indices = @transform_3, window_bounds = array<i64: 1, 96>}, {pipeline_mode = #tpu.pipeline_mode<synchronous>, transform_indices = @transform_4, window_bounds = array<i64: 32, 32>}, {pipeline_mode = #tpu.pipeline_mode<synchronous>, transform_indices = @transform_5, window_bounds = array<i64: 1, 32>}, {pipeline_mode = #tpu.pipeline_mode<synchronous>, transform_indices = @transform_6, window_bounds = array<i64: 1, 32>}, {pipeline_mode = #tpu.pipeline_mode<synchronous>, transform_indices = @transform_7, window_bounds = array<i64: 1, 32>}, {pipeline_mode = #tpu.pipeline_mode<synchronous>, transform_indices = @transform_8, window_bounds = array<i64: 32, 64>}, {pipeline_mode = #tpu.pipeline_mode<synchronous>, transform_indices = @transform_9, window_bounds = array<i64: 1, 64>}, {pipeline_mode = #tpu.pipeline_mode<synchronous>, transform_indices = @transform_10, window_bounds = array<i64: 64, 32>}, {pipeline_mode = #tpu.pipeline_mode<synchronous>, transform_indices = @transform_11, window_bounds = array<i64: 1, 32>}, {pipeline_mode = #tpu.pipeline_mode<synchronous>, transform_indices = @transform_12, window_bounds = array<i64: 1, 32>}, {pipeline_mode = #tpu.pipeline_mode<synchronous>, transform_indices = @transform_13, window_bounds = array<i64: 1, 32>}, {transform_indices = @transform_14, window_bounds = array<i64: 1, 8, 32>}]} {
    %c0 = arith.constant 0 : index
    %c0_0 = arith.constant 0 : index
    %c0_1 = arith.constant 0 : index
    %0 = vector.load %arg3[%c0, %c0_0, %c0_1] : memref<1x1x8xf32, #tpu.memory_space<vmem>>, vector<1x1x8xf32>
    %1 = vector.shape_cast %0 : vector<1x1x8xf32> to vector<1x8xf32>
    %cst = arith.constant 0.000000e+00 : f32
    %2 = vector.broadcast %cst : f32 to vector<1x8xf32>
    %3 = arith.cmpf oeq, %1, %2 : vector<1x8xf32>
    %4 = vector.shape_cast %3 : vector<1x8xi1> to vector<1x1x8xi1>
    %c0_2 = arith.constant 0 : index
    %c0_3 = arith.constant 0 : index
    %c0_4 = arith.constant 0 : index
    %5 = vector.load %arg2[%c0_2, %c0_3, %c0_4] : memref<1x8x32xbf16, #tpu.memory_space<vmem>>, vector<1x8x32xbf16>
    %6 = vector.shape_cast %5 : vector<1x8x32xbf16> to vector<8x32xbf16>
    %c0_5 = arith.constant 0 : index
    %c0_6 = arith.constant 0 : index
    %7 = vector.load %arg4[%c0_5, %c0_6] : memref<32x96xbf16, #tpu.memory_space<vmem>>, vector<32x96xbf16>
    %cst_7 = arith.constant dense<0.000000e+00> : vector<8x96xf32>
    %8 = tpu.matmul %6, %7, %cst_7 {dimension_numbers = #tpu.dot_dimension_numbers<[1], [0], [0], [1], [0, 0, 1, 1], [], []>} : vector<8x32xbf16>, vector<32x96xbf16>, vector<8x96xf32> -> vector<8x96xf32>
    %c0_8 = arith.constant 0 : index
    %c0_9 = arith.constant 0 : index
    %9 = vector.load %arg5[%c0_8, %c0_9] : memref<1x96xf32, #tpu.memory_space<vmem>>, vector<1x96xf32>
    %10 = vector.broadcast %9 : vector<1x96xf32> to vector<8x96xf32>
    %11 = arith.addf %8, %10 : vector<8x96xf32>
    %12 = vector.extract_strided_slice %11 {offsets = [0, 0], sizes = [8, 32], strides = [1, 1]} : vector<8x96xf32> to vector<8x32xf32>
    %13 = vector.extract_strided_slice %11 {offsets = [0, 32], sizes = [8, 32], strides = [1, 1]} : vector<8x96xf32> to vector<8x32xf32>
    %14 = arith.truncf %13 : vector<8x32xf32> to vector<8x32xbf16>
    %15 = vector.extract_strided_slice %11 {offsets = [0, 64], sizes = [8, 32], strides = [1, 1]} : vector<8x96xf32> to vector<8x32xf32>
    %16 = arith.truncf %15 : vector<8x32xf32> to vector<8x32xbf16>
    %17 = arith.extf %6 : vector<8x32xbf16> to vector<8x32xf32>
    %18 = arith.truncf %12 : vector<8x32xf32> to vector<8x32xbf16>
    %19 = vector.shape_cast %18 : vector<8x32xbf16> to vector<8x4x8xbf16>
    %20 = tpu.transpose %19, [1, 0, 2] : vector<8x4x8xbf16> -> vector<4x8x8xbf16>
    %21 = vector.shape_cast %14 : vector<8x32xbf16> to vector<8x4x8xbf16>
    %22 = tpu.transpose %21, [1, 0, 2] : vector<8x4x8xbf16> -> vector<4x8x8xbf16>
    %23 = vector.shape_cast %16 : vector<8x32xbf16> to vector<8x4x8xbf16>
    %24 = tpu.transpose %23, [1, 0, 2] : vector<8x4x8xbf16> -> vector<4x8x8xbf16>
    "tpu.trace_start"() <{level = 10 : i32, message = "hqd,hkd->hqk"}> : () -> ()
    %cst_10 = arith.constant dense<0.000000e+00> : vector<4x8x8xf32>
    %25 = tpu.matmul %20, %22, %cst_10 {dimension_numbers = #tpu.dot_dimension_numbers<[2], [2], [1], [1], [0, 0, 0, 1, 1, 1], [0], [0]>} : vector<4x8x8xbf16>, vector<4x8x8xbf16>, vector<4x8x8xf32> -> vector<4x8x8xf32>
    %cst_11 = arith.constant -3.40282347E+38 : f32
    "tpu.trace_stop"() : () -> ()
    %26 = vector.shape_cast %4 : vector<1x1x8xi1> to vector<1x1x8xi1>
    %27 = vector.broadcast %26 : vector<1x1x8xi1> to vector<4x8x8xi1>
    %28 = vector.broadcast %cst_11 : f32 to vector<4x8x8xf32>
    %29 = arith.select %27, %28, %25 : vector<4x8x8xi1>, vector<4x8x8xf32>
    %cst_12 = arith.constant dense<0xFF800000> : vector<4x8xf32>
    %30 = vector.multi_reduction <maximumf>, %29, %cst_12 [2] : vector<4x8x8xf32> to vector<4x8xf32>
    %31 = vector.shape_cast %30 : vector<4x8xf32> to vector<4x8x1xf32>
    %32 = vector.broadcast %31 : vector<4x8x1xf32> to vector<4x8x8xf32>
    %33 = arith.subf %29, %32 : vector<4x8x8xf32>
    %34 = math.exp %33 : vector<4x8x8xf32>
    %cst_13 = arith.constant dense<0.000000e+00> : vector<4x8xf32>
    %35 = vector.multi_reduction <add>, %34, %cst_13 [2] : vector<4x8x8xf32> to vector<4x8xf32>
    %36 = vector.shape_cast %35 : vector<4x8xf32> to vector<4x8x1xf32>
    %37 = tpu.reciprocal %36 {approx = true} : vector<4x8x1xf32> -> vector<4x8x1xf32>
    %38 = vector.broadcast %37 : vector<4x8x1xf32> to vector<4x8x8xf32>
    %39 = arith.mulf %34, %38 : vector<4x8x8xf32>
    %40 = arith.truncf %39 : vector<4x8x8xf32> to vector<4x8x8xbf16>
    "tpu.trace_start"() <{level = 10 : i32, message = "hqk,hkd->hqd"}> : () -> ()
    %cst_14 = arith.constant dense<0.000000e+00> : vector<4x8x8xf32>
    %41 = tpu.matmul %40, %24, %cst_14 {dimension_numbers = #tpu.dot_dimension_numbers<[2], [1], [1], [2], [0, 0, 0, 1, 1, 2], [0], [0]>} : vector<4x8x8xbf16>, vector<4x8x8xbf16>, vector<4x8x8xf32> -> vector<4x8x8xf32>
    "tpu.trace_stop"() : () -> ()
    %42 = arith.truncf %41 : vector<4x8x8xf32> to vector<4x8x8xbf16>
    %43 = tpu.transpose %42, [1, 0, 2] : vector<4x8x8xbf16> -> vector<8x4x8xbf16>
    %44 = vector.shape_cast %43 : vector<8x4x8xbf16> to vector<8x32xbf16>
    %c0_15 = arith.constant 0 : index
    %c0_16 = arith.constant 0 : index
    %45 = vector.load %arg6[%c0_15, %c0_16] : memref<32x32xbf16, #tpu.memory_space<vmem>>, vector<32x32xbf16>
    %cst_17 = arith.constant dense<0.000000e+00> : vector<8x32xf32>
    %46 = tpu.matmul %44, %45, %cst_17 {dimension_numbers = #tpu.dot_dimension_numbers<[1], [0], [0], [1], [0, 0, 1, 1], [], []>} : vector<8x32xbf16>, vector<32x32xbf16>, vector<8x32xf32> -> vector<8x32xf32>
    %c0_18 = arith.constant 0 : index
    %c0_19 = arith.constant 0 : index
    %47 = vector.load %arg7[%c0_18, %c0_19] : memref<1x32xf32, #tpu.memory_space<vmem>>, vector<1x32xf32>
    %48 = vector.broadcast %47 : vector<1x32xf32> to vector<8x32xf32>
    %49 = arith.addf %46, %48 : vector<8x32xf32>
    %50 = arith.addf %49, %17 : vector<8x32xf32>
    %c0_20 = arith.constant 0 : index
    %c0_21 = arith.constant 0 : index
    %51 = vector.load %arg8[%c0_20, %c0_21] : memref<1x32xf32, #tpu.memory_space<vmem>>, vector<1x32xf32>
    %c0_22 = arith.constant 0 : index
    %c0_23 = arith.constant 0 : index
    %52 = vector.load %arg9[%c0_22, %c0_23] : memref<1x32xf32, #tpu.memory_space<vmem>>, vector<1x32xf32>
    %cst_24 = arith.constant dense<0.000000e+00> : vector<8xf32>
    %53 = vector.multi_reduction <add>, %50, %cst_24 [1] : vector<8x32xf32> to vector<8xf32>
    %54 = vector.shape_cast %53 : vector<8xf32> to vector<8x1xf32>
    %cst_25 = arith.constant 3.200000e+01 : f32
    %55 = vector.broadcast %cst_25 : f32 to vector<8x1xf32>
    %56 = arith.divf %54, %55 : vector<8x1xf32>
    %57 = vector.broadcast %56 : vector<8x1xf32> to vector<8x32xf32>
    %58 = arith.subf %50, %57 : vector<8x32xf32>
    %59 = arith.mulf %58, %58 : vector<8x32xf32>
    %cst_26 = arith.constant dense<0.000000e+00> : vector<8xf32>
    %60 = vector.multi_reduction <add>, %59, %cst_26 [1] : vector<8x32xf32> to vector<8xf32>
    %61 = vector.shape_cast %60 : vector<8xf32> to vector<8x1xf32>
    %cst_27 = arith.constant 3.200000e+01 : f32
    %62 = vector.broadcast %cst_27 : f32 to vector<8x1xf32>
    %63 = arith.divf %61, %62 : vector<8x1xf32>
    %cst_28 = arith.constant 9.99999996E-13 : f32
    %64 = vector.broadcast %cst_28 : f32 to vector<8x1xf32>
    %65 = arith.addf %63, %64 : vector<8x1xf32>
    %66 = math.rsqrt %65 : vector<8x1xf32>
    %67 = vector.broadcast %56 : vector<8x1xf32> to vector<8x32xf32>
    %68 = arith.subf %50, %67 : vector<8x32xf32>
    %69 = vector.broadcast %66 : vector<8x1xf32> to vector<8x32xf32>
    %70 = arith.mulf %68, %69 : vector<8x32xf32>
    %71 = vector.broadcast %51 : vector<1x32xf32> to vector<8x32xf32>
    %72 = arith.mulf %70, %71 : vector<8x32xf32>
    %73 = vector.broadcast %52 : vector<1x32xf32> to vector<8x32xf32>
    %74 = arith.addf %72, %73 : vector<8x32xf32>
    %75 = arith.truncf %74 : vector<8x32xf32> to vector<8x32xbf16>
    %c0_29 = arith.constant 0 : index
    %c0_30 = arith.constant 0 : index
    %76 = vector.load %arg10[%c0_29, %c0_30] : memref<32x64xbf16, #tpu.memory_space<vmem>>, vector<32x64xbf16>
    %cst_31 = arith.constant dense<0.000000e+00> : vector<8x64xf32>
    %77 = tpu.matmul %75, %76, %cst_31 {dimension_numbers = #tpu.dot_dimension_numbers<[1], [0], [0], [1], [0, 0, 1, 1], [], []>} : vector<8x32xbf16>, vector<32x64xbf16>, vector<8x64xf32> -> vector<8x64xf32>
    %c0_32 = arith.constant 0 : index
    %c0_33 = arith.constant 0 : index
    %78 = vector.load %arg11[%c0_32, %c0_33] : memref<1x64xf32, #tpu.memory_space<vmem>>, vector<1x64xf32>
    %79 = vector.broadcast %78 : vector<1x64xf32> to vector<8x64xf32>
    %80 = arith.addf %77, %79 : vector<8x64xf32>
    %cst_34 = arith.constant 5.000000e-01 : f32
    %81 = vector.broadcast %cst_34 : f32 to vector<8x64xf32>
    %82 = arith.mulf %81, %80 : vector<8x64xf32>
    %cst_35 = arith.constant 0.707106769 : f32
    %83 = vector.broadcast %cst_35 : f32 to vector<8x64xf32>
    %84 = arith.mulf %80, %83 : vector<8x64xf32>
    %85 = math.erf %84 : vector<8x64xf32>
    %cst_36 = arith.constant 1.000000e+00 : f32
    %86 = vector.broadcast %cst_36 : f32 to vector<8x64xf32>
    %87 = arith.addf %86, %85 : vector<8x64xf32>
    %88 = arith.mulf %82, %87 : vector<8x64xf32>
    %89 = arith.truncf %88 : vector<8x64xf32> to vector<8x64xbf16>
    %c0_37 = arith.constant 0 : index
    %c0_38 = arith.constant 0 : index
    %90 = vector.load %arg12[%c0_37, %c0_38] : memref<64x32xbf16, #tpu.memory_space<vmem>>, vector<64x32xbf16>
    %cst_39 = arith.constant dense<0.000000e+00> : vector<8x32xf32>
    %91 = tpu.matmul %89, %90, %cst_39 {dimension_numbers = #tpu.dot_dimension_numbers<[1], [0], [0], [1], [0, 0, 1, 1], [], []>} : vector<8x64xbf16>, vector<64x32xbf16>, vector<8x32xf32> -> vector<8x32xf32>
    %c0_40 = arith.constant 0 : index
    %c0_41 = arith.constant 0 : index
    %92 = vector.load %arg13[%c0_40, %c0_41] : memref<1x32xf32, #tpu.memory_space<vmem>>, vector<1x32xf32>
    %93 = vector.broadcast %92 : vector<1x32xf32> to vector<8x32xf32>
    %94 = arith.addf %91, %93 : vector<8x32xf32>
    %95 = arith.addf %94, %74 : vector<8x32xf32>
    %c0_42 = arith.constant 0 : index
    %c0_43 = arith.constant 0 : index
    %96 = vector.load %arg14[%c0_42, %c0_43] : memref<1x32xf32, #tpu.memory_space<vmem>>, vector<1x32xf32>
    %c0_44 = arith.constant 0 : index
    %c0_45 = arith.constant 0 : index
    %97 = vector.load %arg15[%c0_44, %c0_45] : memref<1x32xf32, #tpu.memory_space<vmem>>, vector<1x32xf32>
    %cst_46 = arith.constant dense<0.000000e+00> : vector<8xf32>
    %98 = vector.multi_reduction <add>, %95, %cst_46 [1] : vector<8x32xf32> to vector<8xf32>
    %99 = vector.shape_cast %98 : vector<8xf32> to vector<8x1xf32>
    %cst_47 = arith.constant 3.200000e+01 : f32
    %100 = vector.broadcast %cst_47 : f32 to vector<8x1xf32>
    %101 = arith.divf %99, %100 : vector<8x1xf32>
    %102 = vector.broadcast %101 : vector<8x1xf32> to vector<8x32xf32>
    %103 = arith.subf %95, %102 : vector<8x32xf32>
    %104 = arith.mulf %103, %103 : vector<8x32xf32>
    %cst_48 = arith.constant dense<0.000000e+00> : vector<8xf32>
    %105 = vector.multi_reduction <add>, %104, %cst_48 [1] : vector<8x32xf32> to vector<8xf32>
    %106 = vector.shape_cast %105 : vector<8xf32> to vector<8x1xf32>
    %cst_49 = arith.constant 3.200000e+01 : f32
    %107 = vector.broadcast %cst_49 : f32 to vector<8x1xf32>
    %108 = arith.divf %106, %107 : vector<8x1xf32>
    %cst_50 = arith.constant 9.99999996E-13 : f32
    %109 = vector.broadcast %cst_50 : f32 to vector<8x1xf32>
    %110 = arith.addf %108, %109 : vector<8x1xf32>
    %111 = math.rsqrt %110 : vector<8x1xf32>
    %112 = vector.broadcast %101 : vector<8x1xf32> to vector<8x32xf32>
    %113 = arith.subf %95, %112 : vector<8x32xf32>
    %114 = vector.broadcast %111 : vector<8x1xf32> to vector<8x32xf32>
    %115 = arith.mulf %113, %114 : vector<8x32xf32>
    %116 = vector.broadcast %96 : vector<1x32xf32> to vector<8x32xf32>
    %117 = arith.mulf %115, %116 : vector<8x32xf32>
    %118 = vector.broadcast %97 : vector<1x32xf32> to vector<8x32xf32>
    %119 = arith.addf %117, %118 : vector<8x32xf32>
    %c0_51 = arith.constant 0 : index
    %c0_52 = arith.constant 0 : index
    %c0_53 = arith.constant 0 : index
    %120 = vector.load %arg16[%c0_51, %c0_52, %c0_53] : memref<1x8x32xf32, #tpu.memory_space<vmem>>, vector<1x8x32xf32>
    %121 = vector.shape_cast %120 : vector<1x8x32xf32> to vector<8x32xf32>
    %122 = vector.shape_cast %119 : vector<8x32xf32> to vector<1x8x32xf32>
    tpu.vector_store %arg16[%c0_51, %c0_52, %c0_53], %122 {strides = array<i32>} : memref<1x8x32xf32, #tpu.memory_space<vmem>>, vector<1x8x32xf32>,
    return
  }
  func.func @transform_0(%arg0: i32, %arg1: i32) -> (i32, i32, i32) {
    %c0_i32 = arith.constant 0 : i32
    %c0_i32_0 = arith.constant 0 : i32
    %c0_i32_1 = arith.constant 0 : i32
    return %arg0, %c0_i32, %c0_i32_0 : i32, i32, i32
  }
  func.func @transform_1(%arg0: i32, %arg1: i32) -> (i32, i32, i32) {
    %c0_i32 = arith.constant 0 : i32
    %c0_i32_0 = arith.constant 0 : i32
    %c0_i32_1 = arith.constant 0 : i32
    return %arg0, %c0_i32, %c0_i32_0 : i32, i32, i32
  }
  func.func @transform_2(%arg0: i32, %arg1: i32) -> (i32, i32) {
    %c0_i32 = arith.constant 0 : i32
    %c0_i32_0 = arith.constant 0 : i32
    %c0_i32_1 = arith.constant 0 : i32
    return %c0_i32, %c0_i32_0 : i32, i32
  }
  func.func @transform_3(%arg0: i32, %arg1: i32) -> (i32, i32) {
    %c0_i32 = arith.constant 0 : i32
    %c0_i32_0 = arith.constant 0 : i32
    %c0_i32_1 = arith.constant 0 : i32
    return %c0_i32, %c0_i32_0 : i32, i32
  }
  func.func @transform_4(%arg0: i32, %arg1: i32) -> (i32, i32) {
    %c0_i32 = arith.constant 0 : i32
    %c0_i32_0 = arith.constant 0 : i32
    %c0_i32_1 = arith.constant 0 : i32
    return %c0_i32, %c0_i32_0 : i32, i32
  }
  func.func @transform_5(%arg0: i32, %arg1: i32) -> (i32, i32) {
    %c0_i32 = arith.constant 0 : i32
    %c0_i32_0 = arith.constant 0 : i32
    %c0_i32_1 = arith.constant 0 : i32
    return %c0_i32, %c0_i32_0 : i32, i32
  }
  func.func @transform_6(%arg0: i32, %arg1: i32) -> (i32, i32) {
    %c0_i32 = arith.constant 0 : i32
    %c0_i32_0 = arith.constant 0 : i32
    %c0_i32_1 = arith.constant 0 : i32
    return %c0_i32, %c0_i32_0 : i32, i32
  }
  func.func @transform_7(%arg0: i32, %arg1: i32) -> (i32, i32) {
    %c0_i32 = arith.constant 0 : i32
    %c0_i32_0 = arith.constant 0 : i32
    %c0_i32_1 = arith.constant 0 : i32
    return %c0_i32, %c0_i32_0 : i32, i32
  }
  func.func @transform_8(%arg0: i32, %arg1: i32) -> (i32, i32) {
    %c0_i32 = arith.constant 0 : i32
    %c0_i32_0 = arith.constant 0 : i32
    %c0_i32_1 = arith.constant 0 : i32
    return %c0_i32, %c0_i32_0 : i32, i32
  }
  func.func @transform_9(%arg0: i32, %arg1: i32) -> (i32, i32) {
    %c0_i32 = arith.constant 0 : i32
    %c0_i32_0 = arith.constant 0 : i32
    %c0_i32_1 = arith.constant 0 : i32
    return %c0_i32, %c0_i32_0 : i32, i32
  }
  func.func @transform_10(%arg0: i32, %arg1: i32) -> (i32, i32) {
    %c0_i32 = arith.constant 0 : i32
    %c0_i32_0 = arith.constant 0 : i32
    %c0_i32_1 = arith.constant 0 : i32
    return %c0_i32, %c0_i32_0 : i32, i32
  }
  func.func @transform_11(%arg0: i32, %arg1: i32) -> (i32, i32) {
    %c0_i32 = arith.constant 0 : i32
    %c0_i32_0 = arith.constant 0 : i32
    %c0_i32_1 = arith.constant 0 : i32
    return %c0_i32, %c0_i32_0 : i32, i32
  }
  func.func @transform_12(%arg0: i32, %arg1: i32) -> (i32, i32) {
    %c0_i32 = arith.constant 0 : i32
    %c0_i32_0 = arith.constant 0 : i32
    %c0_i32_1 = arith.constant 0 : i32
    return %c0_i32, %c0_i32_0 : i32, i32
  }
  func.func @transform_13(%arg0: i32, %arg1: i32) -> (i32, i32) {
    %c0_i32 = arith.constant 0 : i32
    %c0_i32_0 = arith.constant 0 : i32
    %c0_i32_1 = arith.constant 0 : i32
    return %c0_i32, %c0_i32_0 : i32, i32
  }
  func.func @transform_14(%arg0: i32, %arg1: i32) -> (i32, i32, i32) {
    %c0_i32 = arith.constant 0 : i32
    %c0_i32_0 = arith.constant 0 : i32
    return %arg0, %arg1, %c0_i32 : i32, i32, i32
  }
}

</mosaic_0001>

<bundles_post_ra>
// kernel: distilbert_transformer.3
= control target key start
LH: loop header
LB: loop body
LE: loop exit
PB: predicated region body
PF: predicated region fallthrough
CT: control target
= control target key end

     0   :  { %s2866_s0 = inlined_call_operand.vmem [shape: bf16[2,8,32], index: 0, kind: input, shape index: {}]   ;;  %s2867_s1 = inlined_call_operand.vmem [shape: f32[2,1,8], index: 1, kind: input, shape index: {}]   ;;  %s2868_s2 = inlined_call_operand.vmem [shape: bf16[32,96], index: 2, kind: input, shape index: {}]   ;;  %s2869_s3 = inlined_call_operand.vmem [shape: f32[1,96], index: 3, kind: input, shape index: {}]   ;;  %s2870_s4 = inlined_call_operand.vmem [shape: bf16[32,32], index: 4, kind: input, shape index: {}]   ;;  %s2871_s5 = inlined_call_operand.vmem [shape: f32[1,32], index: 5, kind: input, shape index: {}]   ;;  %s2872_s6 = inlined_call_operand.vmem [shape: f32[1,32], index: 6, kind: input, shape index: {}]   ;;  %s2873_s7 = inlined_call_operand.vmem [shape: f32[1,32], index: 7, kind: input, shape index: {}]   ;;  %s2874_s8 = inlined_call_operand.vmem [shape: bf16[32,64], index: 8, kind: input, shape index: {}]   ;;  %s2875_s9 = inlined_call_operand.vmem [shape: f32[1,64], index: 9, kind: input, shape index: {}]   ;;  %s2876_s10 = inlined_call_operand.vmem [shape: bf16[64,32], index: 10, kind: input, shape index: {}]   ;;  %s2877_s11 = inlined_call_operand.vmem [shape: f32[1,32], index: 11, kind: input, shape index: {}]   ;;  %s2878_s12 = inlined_call_operand.vmem [shape: f32[1,32], index: 12, kind: input, shape index: {}]   ;;  %s2879_s13 = inlined_call_operand.vmem [shape: f32[1,32], index: 13, kind: input, shape index: {}]   ;;  %s2880_s14 = inlined_call_operand.hbm [shape: f32[2,8,32], index: 14, kind: output, shape index: {}]  }
   0x1   :  { %2881 = sst [smem:[#allocation5_spill]] %s2866_s0 }
   0x2   :  { %2882 = sst [smem:[#allocation6_spill]] %s2867_s1 }
   0x3   :  { %2883 = sst [smem:[#allocation7_spill]] %s2868_s2 }
   0x4   :  { %2884 = sst [smem:[#allocation8_spill]] %s2869_s3 }
   0x5   :  { %2885 = sst [smem:[#allocation9_spill]] %s2870_s4 }
   0x6   :  { %2886 = sst [smem:[#allocation10_spill]] %s2871_s5 }
   0x7   :  { %2887 = sst [smem:[#allocation11_spill]] %s2872_s6 }
   0x8   :  { %19 = vsyncpa [#allocation3], 0 }
   0x9   :  { %21 = vsyncpa [#allocation3 + $0x1], 0  ;;  %s2474_s29 = smov 0   ;;  %s2476_s30 = smov 0  }
   0xa   :  { %s2478_s15 = smov 0   ;;  %s2480_s16 = smov 0  }
   0xb   :  { %s2482_s17 = smov 0   ;;  %s2484_s18 = smov 0  }
   0xc LB: > { %s2052_s19 = sadd.s32 4294967295, %s2383_s18   ;;  %s2053_s20 = sadd.s32 4294967294, %s2383_s18   ;;  %s2383_s18 = sphi %s2484_s18, %s27_s18   ;;  %s2379_s17 = sphi %s2482_s17, %s2901_s17   ;;  %s2375_s16 = sphi %s2480_s16, %s2900_s16   ;;  %s2371_s15 = sphi %s2478_s15, %s2899_s15   ;;  %s2367_s30 = sphi %s2476_s30, %s2898_s30   ;;  %s2363_s29 = sphi %s2474_s29, %s2897_s29  }
   0xd   : > { %s39_s21 = sadd.s32 1, %s2379_s17  ;;  %s352_s22 = sadd.s32 1, %s2371_s15 }
   0xe   : > { %p41_p0 = scmp.ge.s32.totalorder %s39_s21, 2  ;;  %p362_p1 = scmp.ne.s32.totalorder %s2371_s15, %s2367_s30 }
   0xf   : > { %p363_p2 = scmp.eq.s32.totalorder %s2052_s19, 1  ;;  %p368_p3 = scmp.ne.s32.totalorder %s2367_s30, %s2363_s29 }
  0x10   : > { %s2903_s21 = smov (%p41_p0, %s39_s21), 0  ;;  %p369_p5 = scmp.eq.s32.totalorder %s2053_s20, 1 }
  0x11   : > { %p2514_p4 = por %p363_p2, %p362_p1  ;;  %s347_s24 = ssub.s32 %s2379_s17, %s2903_s21 }
  0x12   : > { %p2056_p6 = scmp.ge.s32.totalorder %s2383_s18, 1  ;;  %p350_p7 = scmp.eq.s32.totalorder %s347_s24, 0 }
  0x13   : > { %p2521_p8 = por %p369_p5, %p368_p3  ;;  %p436_p9 = scmp.lt.s32.totalorder %s2383_s18, 3 }
  0x14   : > { %s2527_s26 = scalar_select %p350_p7, %s2371_s15, %s352_s22  }
  0x15   : > { %p437_p10 = pnand %p2056_p6, %p436_p9 }
  0x16   : > { %s2890_s2 = sld [smem:[#allocation7_spill]] (!%p437_p10)  ;;  %p484_p11 = scmp.lt.s32.totalorder (!%p437_p10), %s2375_s16, 1 }
  0x17   : > { %440 = sbr.rel (%p437_p10) target bundleno = 2644 (0xa54), region = 76  ;;  %s2891_s0 = sld [smem:[#allocation5_spill]] (!%p437_p10) }
  0x18   : > { %s2892_s3 = sld [smem:[#allocation8_spill]] (!%p437_p10)  ;;  %s2388_s27 = smov (!%p437_p10), 120  }
  0x19   : > { %s2389_s28 = smov (!%p437_p10), 96   ;;  %s2893_s1 = sld [smem:[#allocation6_spill]] (!%p437_p10) }
  0x1a   : > { %s2894_s4 = sld [smem:[#allocation9_spill]] (!%p437_p10)  ;;  %s2395_s20 = smov (!%p437_p10), 8  }
  0x1b   : > { %s2895_s5 = sld [smem:[#allocation10_spill]] (!%p437_p10) }
  0x1c   : > { %v2275_v0 = vld [vmem:[%s2890_s2 + $0x8] sm:$0xff]   ;;  %v2385_v1 = vmov 0.0   ;;  %v2276_v2 = vld [vmem:[%s2890_s2] sm:$0xff]   ;;  %vm2386_vm0 = vmmov 0   ;;  %s2544_s22 = scalar_select %p484_p11, %s2375_s16, 1  ;;  %vm518_vm1 = vcmask 261120   ;;  %v574_v16 = vlaneseq }
  0x1d   : > { %2123 = vmatprep.subr.bf16.mxu0 %v2385_v1  ;;  %2131 = vmatprep.subr.bf16.mxu1 %v2385_v1  ;;  %v2391_v14 = vmov 1983009808   ;;  %v2392_v19 = vmov 1934713408   ;;  %v2393_v38 = vmov 0   ;;  %vm1072_vm2 = vcmask 64512  }
  0x1e   : > { %2124 = vmatpush3.bf16.msra.mxu0 %v2275_v0  ;;  %2127 = vmatprep.mubr.msk.bf16.mxu0 %vm2386_vm0, %v2385_v1  ;;  %s2058_s24 = sshll.u32 %s2544_s22, 2  ;;  %v2059_v4 = vld [vmem:[%s2892_s3] ss:$0 sm:$0xff]  ;;  %v572_v15 = vunpack.c.l.s4 %v2391_v14  ;;  %v2575_v18 = vshrl.u32 %v574_v16, 7  ;;  %v589_v20 = vunpack.c.l.s4 %v2392_v19  ;;  %vm1318_vm5 = vcmask 1043456   ;;  %s2896_s6 = sld [smem:[#allocation11_spill]] }
  0x1f   : > { %2125 = vmatprep.subr.bf16.mxu0 %v2385_v1  ;;  %2133 = vmatprep.mubr.msk.bf16.mxu1 %vm2386_vm0, %v2385_v1  ;;  %s487_s19 = scalar_lea.vmem %s2891_s0, %s2058_s24  ;;  %s2387_s24 = smov 104   ;;  %vm1671_vm6 = vcmask 130048   ;;  %vm1674_vm7 = vcmask 195584   ;;  %vm1885_vm8 = vcmask 523264  }
  0x20   : > { %v2551_v3 = vld [vmem:[%s487_s19] sm:$0xf]  ;;  %s2390_s19 = smov 112   ;;  %v573_v17 = vunpack.c.0.s8 %v572_v15  ;;  %v590_v23 = vunpack.c.0.s8 %v589_v20  ;;  %s481_s0 = sand.u32 1, %s2367_s30  }
  0x22   : > { %2126 = vmatpush3.bf16.msra.mxu0 %v2276_v2  ;;  %v2578_v21 = vsub.s32 %v573_v17, %v2575_v18  ;;  %v2589_v27 = vsub.s32 %v590_v23, %v2575_v18 }
  0x23   : > { %2137 = vmatprep.subr.bf16.mxu0 %v2385_v1 }
  0x25   : > { %2128 = vmatmul.mubr.msk.bf16.vlgmr.msra.gmra.mxu0 %vm518_vm1, %v2551_v3 }
  0x26   : > { %2139 = vmatprep.mubr.msk.bf16.mxu0 %vm2386_vm0, %v2385_v1 }
  0xe5   : > { %v556_v5 = vpop.f32.mrf.mxu0 }
  0xe6   : > { %v557_v6 = vadd.f32 %v2059_v4, %v556_v5 }
  0xe7   : > { %v2129_v7 = vpop.f32.mrf.mxu0 }
  0xe8   : > { %v2560_v8 = vpack.c.bf16 %v557_v6, %v557_v6 }
  0xe9   : > { %v559_v9 = vpop.f32.mrf.mxu0 }
  0xea   : > { %569 = vrot.lane.b32.xlu1 %v2560_v8, %s2387_s24  ;;  %565 = vrot.lane.b32.xlu0 %v2560_v8, %s2388_s27  ;;  %v577_v26 = vrot.slane %v2560_v8, %v2578_v21  ;;  %s490_s24 = scalar_lea.vmem %s2893_s1, %s2544_s22  ;;  %s2394_s22 = smov 64  }
  0xeb   : > { %v2130_v10 = vpop.f32.mrf.mxu0  ;;  %s2057_s27 = sshll.u32 %s481_s0, 3 }
  0xee   : > { %732 = vrot.lane.b32.xlu1 %v2560_v8, %s2389_s28  ;;  %567 = vrot.lane.b32.xlu0 %v2560_v8, %s2390_s19  ;;  %s2398_s19 = smov [#allocation2]  }
  0xef   : > { %s2311_s2 = sshll.u32 %s2398_s19, 4  ;;  %s2312_s2 = int_to_ptr.vmem [resolvable:$false] %s2311_s2 }
 0x15c   : > { %v2566_v11 = vpop.permute.xlu0 %565  ;;  %v2569_v12 = vpop.permute.xlu1 %569 }
 0x15d   : > { %734 = vrot.lane.b32.xlu0 %v2566_v11, %s2389_s28  ;;  %v619_v22 = vrot.slane %v2569_v12, %v2578_v21  ;;  %v611_v24 = vrot.slane %v2566_v11, %v2578_v21 }
 0x15f   : > { %v620_v28 = vcombine.low %v611_v24, %v619_v22  ;;  %v621_v31 = vcombine.high %v611_v24, %v619_v22 }
 0x160   : > { %v2571_v13 = vpop.permute.xlu0 %567  ;;  %v733_v37 = vpop.permute.xlu1 %732 }
 0x161   : > { %738 = vrot.lane.b32.xlu0 %v2569_v12, %s2389_s28  ;;  %736 = vrot.lane.b32.xlu1 %v2571_v13, %s2389_s28  ;;  %v585_v25 = vrot.slane %v2571_v13, %v2578_v21  ;;  %v2592_v32 = vrot.slane %v620_v28, %v2589_v27  ;;  %v2601_v35 = vrot.slane %v621_v31, %v2589_v27 }
 0x162   : > { %v747_v44 = vrot.slane %v733_v37, %v2578_v21 }
 0x163   : > { %v586_v29 = vcombine.low %v577_v26, %v585_v25  ;;  %v587_v30 = vcombine.high %v577_v26, %v585_v25  ;;  %v636_v39 = vcombine.high %v2592_v32, %v2393_v38  ;;  %v637_v42 = vcombine.high %v2601_v35, %v2393_v38 }
 0x164   : > { %v643_v43 = vshrl.u32 %v2592_v32, 16  ;;  %v659_v47 = vshrl.u32 %v2601_v35, 16 }
 0x165   : > { %v2595_v33 = vrot.slane %v586_v29, %v2589_v27  ;;  %v2598_v34 = vrot.slane %v587_v30, %v2589_v27  ;;  %v651_v52 = vshrl.u32 %v636_v39, 16  ;;  %v667_v56 = vshrl.u32 %v637_v42, 16 }
 0x167   : > { %v602_v40 = vcombine.high %v2595_v33, %v2393_v38  ;;  %v603_v41 = vcombine.high %v2598_v34, %v2393_v38  ;;  %v642_v45 = vshrl.u32 %v2595_v33, 16  ;;  %v658_v48 = vshrl.u32 %v2598_v34, 16 }
 0x168   : > { %v640_v57 = vpack.i.b16 %v2592_v32, %v2595_v33  ;;  %v656_v33 = vpack.i.b16 %v2601_v35, %v2598_v34 }
 0x169   : > { %v650_v53 = vshrl.u32 %v602_v40, 16  ;;  %v666_v54 = vshrl.u32 %v603_v41, 16  ;;  %v644_v60 = vpack.i.b16 %v643_v43, %v642_v45  ;;  %v648_v61 = vpack.i.b16 %v636_v39, %v602_v40 }
 0x16a   : > { %v660_v0 = vpack.i.b16 %v659_v47, %v658_v48  ;;  %v664_v2 = vpack.i.b16 %v637_v42, %v603_v41  ;;  %v670_v48 = vcombine.low %v640_v57, %v656_v33  ;;  %v1260_v33 = vsub.s32 0, %v2575_v18 }
 0x16b   : > { %v652_v6 = vpack.i.b16 %v651_v52, %v650_v53  ;;  %v668_v7 = vpack.i.b16 %v667_v56, %v666_v54 }
 0x16c   : > { %v678_v43 = vcombine.low %v648_v61, %v664_v2  ;;  %v677_v57 = vrot.slane %v670_v48, %v2578_v21 }
 0x16d   : > { %v703_v42 = vcombine.low %v652_v6, %v668_v7 }
 0x16e   : > { %v685_v53 = vrot.slane %v678_v43, %v2578_v21 }
 0x16f   : > { %v710_v35 = vrot.slane %v703_v42, %v2578_v21 }
 0x1cf   : > { %v735_v36 = vpop.permute.xlu0 %734 }
 0x1d0   : > { %v781_v49 = vrot.slane %v735_v36, %v2578_v21 }
 0x1d3   : > { %v739_v46 = vpop.permute.xlu0 %738  ;;  %v737_v50 = vpop.permute.xlu1 %736 }
 0x1d4   : > { %v789_v51 = vrot.slane %v739_v46, %v2578_v21  ;;  %v755_v55 = vrot.slane %v737_v50, %v2578_v21  ;;  %v695_v46 = vcombine.low %v644_v60, %v660_v0  ;;  %v686_v60 = vcombine.low %v677_v57, %v685_v53 }
 0x1d6   : > { %v790_v58 = vcombine.low %v781_v49, %v789_v51  ;;  %v791_v59 = vcombine.high %v781_v49, %v789_v51  ;;  %v756_v62 = vcombine.low %v747_v44, %v755_v55  ;;  %v757_v63 = vcombine.high %v747_v44, %v755_v55 }
 0x1d7   : > { %v702_v55 = vrot.slane %v695_v46, %v2578_v21 }
 0x1d8   : > { %v798_v4 = vrot.slane %v790_v58, %v2589_v27  ;;  %v805_v5 = vrot.slane %v791_v59, %v2589_v27  ;;  %v764_v9 = vrot.slane %v756_v62, %v2589_v27  ;;  %v771_v10 = vrot.slane %v757_v63, %v2589_v27 }
 0x1d9   : > { %v711_v59 = vcombine.low %v702_v55, %v710_v35 }
 0x1da   : > { %v806_v14 = vcombine.high %v798_v4, %v2393_v38  ;;  %v807_v15 = vcombine.high %v805_v5, %v2393_v38  ;;  %v813_v16 = vshrl.u32 %v798_v4, 16  ;;  %v829_v17 = vshrl.u32 %v805_v5, 16 }
 0x1db   : > { %v772_v19 = vcombine.high %v764_v9, %v2393_v38  ;;  %v773_v20 = vcombine.high %v771_v10, %v2393_v38  ;;  %v812_v22 = vshrl.u32 %v764_v9, 16  ;;  %v828_v23 = vshrl.u32 %v771_v10, 16 }
 0x1dc   : > { %v810_v24 = vpack.i.b16 %v798_v4, %v764_v9  ;;  %v821_v25 = vshrl.u32 %v806_v14, 16  ;;  %v826_v26 = vpack.i.b16 %v805_v5, %v771_v10  ;;  %v837_v28 = vshrl.u32 %v807_v15, 16 }
 0x1dd   : > { %v820_v29 = vshrl.u32 %v772_v19, 16  ;;  %v836_v30 = vshrl.u32 %v773_v20, 16  ;;  %v814_v31 = vpack.i.b16 %v813_v16, %v812_v22  ;;  %v818_v32 = vpack.i.b16 %v806_v14, %v772_v19 }
 0x1de   : > { %v830_v36 = vpack.i.b16 %v829_v17, %v828_v23  ;;  %v834_v37 = vpack.i.b16 %v807_v15, %v773_v20  ;;  %v840_v39 = vcombine.low %v810_v24, %v826_v26  ;;  %v718_v5 = vrot.slane %v711_v59, %v2589_v27 }
 0x1df   : > { %v822_v40 = vpack.i.b16 %v821_v25, %v820_v29  ;;  %v838_v41 = vpack.i.b16 %v837_v28, %v836_v30  ;;  %v693_v9 = vrot.slane %v686_v60, %v2589_v27 }
 0x1e0   : > { %v848_v44 = vcombine.low %v818_v32, %v834_v37  ;;  %v865_v45 = vcombine.low %v814_v31, %v830_v36  ;;  %v847_v49 = vrot.slane %v840_v39, %v2578_v21  ;;  %v724_v15 = vshrl.u32 %v718_v5, 16  ;;  %v492_v32 = vld [vmem:[%s490_s24] sm:$0x1]  ;;  %s2396_s24 = smov 16  }
 0x1e1   : > { %v873_v47 = vcombine.low %v822_v40, %v838_v41  ;;  %v722_v17 = vpack.i.b16 %v718_v5, %v693_v9  ;;  %v723_v19 = vshrl.u32 %v693_v9, 16  ;;  %v719_v24 = vcombine.high %v718_v5, %v2393_v38 }
 0x1e2   : > { %v855_v50 = vrot.slane %v848_v44, %v2578_v21  ;;  %v872_v51 = vrot.slane %v865_v45, %v2578_v21  ;;  %v694_v26 = vcombine.high %v693_v9, %v2393_v38  ;;  %vm493_vm3 = vcmp.eq.f32.partialorder %v492_v32, 0.0 }
 0x1e3   : > { %v880_v34 = vrot.slane %v873_v47, %v2578_v21  ;;  %v725_v23 = vpack.i.b16 %v724_v15, %v723_v19  ;;  %v730_v28 = vshrl.u32 %v719_v24, 16  ;;  %v1257_v36 = vsel %vm493_vm3, 1, %v2393_v38 }
 0x1e4   : > { %v856_v52 = vcombine.low %v847_v49, %v855_v50  ;;  %v728_v29 = vpack.i.b16 %v719_v24, %v694_v26  ;;  %v729_v30 = vshrl.u32 %v694_v26, 16  ;;  %v1261_v37 = vrot.slane %v1257_v36, %v1260_v33 }
 0x1e5   : > { %v881_v54 = vcombine.low %v872_v51, %v880_v34 }
 0x1e6   : > { %v863_v56 = vrot.slane %v856_v52, %v2589_v27  ;;  %v731_v31 = vpack.i.b16 %v730_v28, %v729_v30  ;;  %vm1262_vm4 = vcmp.eq.s32.totalorder %v1261_v37, 1 }
 0x1e7   : > { %v888_v58 = vrot.slane %v881_v54, %v2589_v27 }
 0x1e8   : > { %v893_v62 = vshrl.u32 %v863_v56, 16  ;;  %v864_v6 = vcombine.high %v863_v56, %v2393_v38 }
 0x1e9   : > { %v892_v61 = vpack.i.b16 %v888_v58, %v863_v56  ;;  %v894_v63 = vshrl.u32 %v888_v58, 16  ;;  %v889_v0 = vcombine.high %v888_v58, %v2393_v38 }
 0x1ea   : > { %v899_v16 = vshrl.u32 %v864_v6, 16 }
 0x1eb   : > { %v1077_v2 = vsel %vm1072_vm2, %v892_v61, 0  ;;  %v895_v4 = vpack.i.b16 %v894_v63, %v893_v62  ;;  %v900_v10 = vshrl.u32 %v889_v0, 16  ;;  %v898_v14 = vpack.i.b16 %v889_v0, %v864_v6 }
 0x1ec   : > { %2132 = vmatpush3.bf16.xpose.msra.mxu1 %v1077_v2 }
 0x1ed   : > { %v1123_v7 = vsel %vm1072_vm2, %v895_v4, 0  ;;  %2143 = vmatprep.subr.bf16.mxu1 %v2385_v1  ;;  %v901_v20 = vpack.i.b16 %v900_v10, %v899_v16  ;;  %v1169_v22 = vsel %vm1072_vm2, %v898_v14, 0 }
 0x1ee   : > { %2138 = vmatpush3.bf16.xpose.msra.mxu0 %v1123_v7 }
 0x1ef   : > { %2149 = vmatprep.subr.bf16.mxu0 %v2385_v1  ;;  %v1215_v25 = vsel %vm1072_vm2, %v901_v20, 0 }
 0x1f3   : > { %2134 = vmatmul.mubr.msk.bf16.vlgmr.msra.gmra.mxu1 %vm1072_vm2, %v722_v17 }
 0x1f4   : > { %2144 = vmatpush3.bf16.xpose.msra.mxu1 %v1169_v22  ;;  %2145 = vmatprep.mubr.msk.bf16.mxu1 %vm2386_vm0, %v2385_v1 }
 0x1f5   : > { %2140 = vmatmul.mubr.msk.bf16.vlgmr.msra.gmra.mxu0 %vm1072_vm2, %v725_v23  ;;  %2155 = vmatprep.subr.bf16.mxu1 %v2385_v1 }
 0x1f6   : > { %2150 = vmatpush3.bf16.xpose.msra.mxu0 %v1215_v25  ;;  %2151 = vmatprep.mubr.msk.bf16.mxu0 %vm2386_vm0, %v2385_v1 }
 0x1f7   : > { %2161 = vmatprep.subr.bf16.mxu0 %v2385_v1 }
 0x1fb   : > { %2146 = vmatmul.mubr.msk.bf16.vlgmr.msra.gmra.mxu1 %vm1072_vm2, %v728_v29 }
 0x1fc   : > { %2157 = vmatprep.mubr.msk.bf16.mxu1 %vm2386_vm0, %v2385_v1 }
 0x1fd   : > { %2152 = vmatmul.mubr.msk.bf16.vlgmr.msra.gmra.mxu0 %vm1072_vm2, %v731_v31 }
 0x1fe   : > { %2163 = vmatprep.mubr.msk.bf16.mxu0 %vm2386_vm0, %v2385_v1 }
 0x2b3   : > { %v1113_v39 = vpop.f32.mrf.mxu1 }
 0x2b4   : > { %v1263_v40 = vsel %vm1262_vm4, -3.4028235e+38, %v1113_v39 }
 0x2b5   : > { %v2135_v41 = vpop.f32.mrf.mxu1  ;;  %v1159_v42 = vpop.f32.mrf.mxu0  ;;  %v1267_v43 = vsel %vm1072_vm2, %v1263_v40, -inf }
 0x2b6   : > { %v1264_v44 = vsel %vm1262_vm4, -3.4028235e+38, %v1159_v42  ;;  %1268 = vmax.xlane.f32.xlu1 %v1267_v43 }
 0x2b7   : > { %v1116_v45 = vpop.f32.mrf.mxu1  ;;  %v2141_v46 = vpop.f32.mrf.mxu0  ;;  %v1270_v47 = vsel %vm1072_vm2, %v1264_v44, -inf }
 0x2b8   : > { %1271 = vmax.xlane.f32.xlu0 %v1270_v47 }
 0x2b9   : > { %v2136_v18 = vpop.f32.mrf.mxu1  ;;  %v1162_v48 = vpop.f32.mrf.mxu0 }
 0x2bb   : > { %v2142_v49 = vpop.f32.mrf.mxu0  ;;  %v1205_v50 = vpop.f32.mrf.mxu1 }
 0x2bc   : > { %v1265_v51 = vsel %vm1262_vm4, -3.4028235e+38, %v1205_v50 }
 0x2bd   : > { %v2147_v34 = vpop.f32.mrf.mxu1  ;;  %v1251_v35 = vpop.f32.mrf.mxu0  ;;  %v1273_v52 = vsel %vm1072_vm2, %v1265_v51, -inf }
 0x2be   : > { %v1266_v53 = vsel %vm1262_vm4, -3.4028235e+38, %v1251_v35  ;;  %1274 = vmax.xlane.f32.xlu0 %v1273_v52 }
 0x2bf   : > { %v1208_v54 = vpop.f32.mrf.mxu1  ;;  %v2153_v55 = vpop.f32.mrf.mxu0  ;;  %v1276_v56 = vsel %vm1072_vm2, %v1266_v53, -inf }
 0x2c0   : > { %1277 = vmax.xlane.f32.xlu1 %v1276_v56 }
 0x2c1   : > { %v2148_v57 = vpop.f32.mrf.mxu1  ;;  %v1254_v58 = vpop.f32.mrf.mxu0 }
 0x2c3   : > { %v2154_v59 = vpop.f32.mrf.mxu0 }
 0x2d1   : > { %904 = vrot.lane.b32.xlu1 %v2566_v11, %s2394_s22 }
 0x2d4   : > { %902 = vrot.lane.b32.xlu0 %v2560_v8, %s2394_s22 }
 0x33f   : > { %v1269_v60 = vpop.xlane.xlu1 %1268 }
 0x340   : > { %v1279_v61 = vsub.f32 %v1263_v40, %v1269_v60 }
 0x341   : > { %v1272_v62 = vpop.xlane.xlu0 %1271 }
 0x342   : > { %v1283_v63 = vmul.f32 1.442695, %v1279_v61  ;;  %v1280_v0 = vsub.f32 %v1264_v44, %v1272_v62 }
 0x344   : > { %2285 = vpow2.f32 %v1283_v63  ;;  %v1285_v2 = vmul.f32 1.442695, %v1280_v0 }
 0x346   : > { %2287 = vpow2.f32 %v1285_v2 }
 0x347   : > { %v1275_v7 = vpop.xlane.xlu0 %1274 }
 0x348   : > { %v1281_v10 = vsub.f32 %v1265_v51, %v1275_v7 }
 0x349   : > { %v1278_v8 = vpop.xlane.xlu1 %1277 }
 0x34a   : > { %v1282_v9 = vsub.f32 %v1266_v53, %v1278_v8  ;;  %v1287_v15 = vmul.f32 1.442695, %v1281_v10 }
 0x34c   : > { %v1289_v14 = vmul.f32 1.442695, %v1282_v9 }
 0x34d   : > { %v905_v20 = vpop.permute.xlu1 %904 }
 0x34e   : > { %2289 = vpow2.f32 %v1289_v14  ;;  %v951_v25 = vrot.slane %v905_v20, %v2578_v21 }
 0x34f   : > { %2291 = vpow2.f32 %v1287_v15 }
 0x351   : > { %v2683_v4 = vpop.eup %2285 }
 0x352   : > { %v1291_v5 = vsel %vm1072_vm2, %v2683_v4, 0.0 }
 0x353   : > { %v2687_v6 = vpop.eup %2287  ;;  %1292 = vadd.xlane.f32.xlu0 %v1291_v5 }
 0x354   : > { %v1294_v11 = vsel %vm1072_vm2, %v2687_v6, 0.0 }
 0x355   : > { %1295 = vadd.xlane.f32.xlu1 %v1294_v11 }
 0x35b   : > { %v2693_v16 = vpop.eup %2289 }
 0x35c   : > { %v2695_v17 = vpop.eup %2291  ;;  %v1300_v19 = vsel %vm1072_vm2, %v2693_v16, 0.0 }
 0x366   : > { %906 = vrot.lane.b32.xlu1 %v2571_v13, %s2394_s22  ;;  %v1297_v13 = vsel %vm1072_vm2, %v2695_v17, 0.0 }
 0x369   : > { %908 = vrot.lane.b32.xlu0 %v2569_v12, %s2394_s22  ;;  %v903_v12 = vpop.permute.xlu0 %902  ;;  %s2397_s22 = smov 24  }
 0x36a   : > { %v917_v29 = vrot.slane %v903_v12, %v2578_v21 }
 0x388   : > { %1301 = vadd.xlane.f32.xlu0 %v1300_v19 }
 0x38a   : > { %1298 = vadd.xlane.f32.xlu1 %v1297_v13 }
 0x3dc   : > { %v1293_v22 = vpop.xlane.xlu0 %1292 }
 0x3dd   : > { %2293 = vrcp.f32 %v1293_v22 }
 0x3de   : > { %v1296_v23 = vpop.xlane.xlu1 %1295 }
 0x3df   : > { %2295 = vrcp.f32 %v1296_v23 }
 0x3e0   : > { %v909_v24 = vpop.permute.xlu0 %908 }
 0x3e1   : > { %v959_v26 = vrot.slane %v909_v24, %v2578_v21 }
 0x3e2   : > { %v907_v28 = vpop.permute.xlu1 %906 }
 0x3e3   : > { %v960_v30 = vcombine.low %v951_v25, %v959_v26  ;;  %v961_v31 = vcombine.high %v951_v25, %v959_v26  ;;  %v925_v32 = vrot.slane %v907_v28, %v2578_v21 }
 0x3e5   : > { %v968_v33 = vrot.slane %v960_v30, %v2589_v27  ;;  %v975_v36 = vrot.slane %v961_v31, %v2589_v27  ;;  %v926_v37 = vcombine.low %v917_v29, %v925_v32  ;;  %v927_v39 = vcombine.high %v917_v29, %v925_v32 }
 0x3e7   : > { %v976_v40 = vcombine.high %v968_v33, %v2393_v38  ;;  %v934_v41 = vrot.slane %v926_v37, %v2589_v27  ;;  %v941_v42 = vrot.slane %v927_v39, %v2589_v27  ;;  %v977_v43 = vcombine.high %v975_v36, %v2393_v38 }
 0x3e8   : > { %v983_v44 = vshrl.u32 %v968_v33, 16  ;;  %v999_v49 = vshrl.u32 %v975_v36, 16 }
 0x3e9   : > { %v942_v45 = vcombine.high %v934_v41, %v2393_v38  ;;  %v943_v46 = vcombine.high %v941_v42, %v2393_v38  ;;  %v980_v47 = vpack.i.b16 %v968_v33, %v934_v41  ;;  %v982_v18 = vshrl.u32 %v934_v41, 16 }
 0x3ea   : > { %v991_v48 = vshrl.u32 %v976_v40, 16  ;;  %v996_v50 = vpack.i.b16 %v975_v36, %v941_v42  ;;  %v998_v51 = vshrl.u32 %v941_v42, 16  ;;  %v1007_v54 = vshrl.u32 %v977_v43, 16  ;;  %v2294_v7 = vpop.eup %2293 }
 0x3eb   : > { %v984_v34 = vpack.i.b16 %v983_v44, %v982_v18  ;;  %v988_v35 = vpack.i.b16 %v976_v40, %v942_v45  ;;  %v990_v52 = vshrl.u32 %v942_v45, 16  ;;  %v1004_v53 = vpack.i.b16 %v977_v43, %v943_v46  ;;  %v2277_v45 = vld [vmem:[%s2894_s4 + $0x8] sm:$0xff]  }
 0x3ec   : > { %v1000_v55 = vpack.i.b16 %v999_v49, %v998_v51  ;;  %v1006_v56 = vshrl.u32 %v943_v46, 16  ;;  %v1010_v57 = vcombine.low %v980_v47, %v996_v50  ;;  %v2296_v10 = vpop.eup %2295  ;;  %v1307_v19 = vmul.f32 %v2294_v7, %v2683_v4 }
 0x3ed   : > { %v992_v58 = vpack.i.b16 %v991_v48, %v990_v52  ;;  %v1018_v59 = vcombine.low %v988_v35, %v1004_v53  ;;  %v1308_v23 = vmul.f32 %v2296_v10, %v2687_v6 }
 0x3ee   : > { %v1008_v60 = vpack.i.b16 %v1007_v54, %v1006_v56  ;;  %v1035_v61 = vcombine.low %v984_v34, %v1000_v55  ;;  %v1017_v62 = vrot.slane %v1010_v57, %v2578_v21  ;;  %v1311_v31 = vpack.c.bf16 %v1307_v19, %v1307_v19 }
 0x3ef   : > { %v1025_v63 = vrot.slane %v1018_v59, %v2578_v21  ;;  %v1312_v33 = vpack.c.bf16 %v1308_v23, %v1308_v23 }
 0x3f0   : > { %v1043_v0 = vcombine.low %v992_v58, %v1008_v60  ;;  %v1042_v5 = vrot.slane %v1035_v61, %v2578_v21 }
 0x3f1   : > { %v1026_v2 = vcombine.low %v1017_v62, %v1025_v63 }
 0x3f2   : > { %v1050_v11 = vrot.slane %v1043_v0, %v2578_v21 }
 0x3f3   : > { %v1033_v8 = vrot.slane %v1026_v2, %v2589_v27 }
 0x3f4   : > { %v1051_v9 = vcombine.low %v1042_v5, %v1050_v11 }
 0x3f5   : > { %v1034_v14 = vcombine.high %v1033_v8, %v2393_v38  ;;  %v1063_v12 = vshrl.u32 %v1033_v8, 16 }
 0x3f6   : > { %v1058_v15 = vrot.slane %v1051_v9, %v2589_v27 }
 0x3f7   : > { %v1069_v24 = vshrl.u32 %v1034_v14, 16 }
 0x3f8   : > { %v1062_v13 = vpack.i.b16 %v1058_v15, %v1033_v8  ;;  %v1064_v20 = vshrl.u32 %v1058_v15, 16  ;;  %v1059_v22 = vcombine.high %v1058_v15, %v2393_v38 }
 0x3fa   : > { %v1320_v25 = vsel %vm1318_vm5, %v1062_v13, 0  ;;  %v1065_v26 = vpack.i.b16 %v1064_v20, %v1063_v12  ;;  %v1068_v28 = vpack.i.b16 %v1059_v22, %v1034_v14  ;;  %v1070_v29 = vshrl.u32 %v1059_v22, 16 }
 0x3fb   : > { %2156 = vmatpush3.bf16.msra.mxu1 %v1320_v25 }
 0x3fc   : > { %v1366_v30 = vsel %vm1318_vm5, %v1065_v26, 0  ;;  %2167 = vmatprep.subr.bf16.mxu1 %v2385_v1  ;;  %v1071_v4 = vpack.i.b16 %v1070_v29, %v1069_v24  ;;  %v1412_v32 = vsel %vm1318_vm5, %v1068_v28, 0 }
 0x3fd   : > { %2162 = vmatpush3.bf16.msra.mxu0 %v1366_v30 }
 0x3fe   : > { %2158 = vmatmul.mubr.msk.bf16.vlgmr.msra.gmra.mxu1 %vm1072_vm2, %v1311_v31  ;;  %2173 = vmatprep.subr.bf16.mxu0 %v2385_v1  ;;  %v1458_v6 = vsel %vm1318_vm5, %v1071_v4, 0 }
 0x3ff   : > { %2168 = vmatpush3.bf16.msra.mxu1 %v1412_v32  ;;  %2169 = vmatprep.mubr.msk.bf16.mxu1 %vm2386_vm0, %v2385_v1 }
 0x400   : > { %2164 = vmatmul.mubr.msk.bf16.vlgmr.msra.gmra.mxu0 %vm1072_vm2, %v1312_v33  ;;  %2179 = vmatprep.subr.bf16.mxu1 %v2385_v1 }
 0x401   : > { %2174 = vmatpush3.bf16.msra.mxu0 %v1458_v6  ;;  %2175 = vmatprep.mubr.msk.bf16.mxu0 %vm2386_vm0, %v2385_v1 }
 0x402   : > { %2187 = vmatprep.subr.bf16.mxu0 %v2385_v1 }
 0x411   : > { %v1302_v36 = vpop.xlane.xlu0 %1301 }
 0x412   : > { %2297 = vrcp.f32 %v1302_v36 }
 0x413   : > { %v1299_v37 = vpop.xlane.xlu1 %1298 }
 0x414   : > { %2299 = vrcp.f32 %v1299_v37 }
 0x41f   : > { %v2298_v39 = vpop.eup %2297 }
 0x420   : > { %v1310_v40 = vmul.f32 %v2298_v39, %v2693_v16 }
 0x421   : > { %v2300_v41 = vpop.eup %2299 }
 0x422   : > { %v1314_v42 = vpack.c.bf16 %v1310_v40, %v1310_v40  ;;  %v1309_v43 = vmul.f32 %v2300_v41, %v2695_v17 }
 0x424   : > { %2176 = vmatmul.mubr.msk.bf16.vlgmr.msra.gmra.mxu0 %vm1072_vm2, %v1314_v42  ;;  %v1313_v44 = vpack.c.bf16 %v1309_v43, %v1309_v43 }
 0x425   : > { %2191 = vmatprep.mubr.msk.bf16.mxu0 %vm2386_vm0, %v2385_v1 }
 0x426   : > { %2170 = vmatmul.mubr.msk.bf16.vlgmr.msra.gmra.mxu1 %vm1072_vm2, %v1313_v44  ;;  %v2278_v44 = vld [vmem:[%s2894_s4] sm:$0xff]  }
 0x427   : > { %2183 = vmatprep.mubr.msk.bf16.mxu1 %vm2386_vm0, %v2385_v1  ;;  %2180 = vmatpush3.bf16.msra.mxu1 %v2277_v45 }
 0x428   : > { %2181 = vmatprep.subr.bf16.mxu1 %v2385_v1 }
 0x42b   : > { %2182 = vmatpush3.bf16.msra.mxu1 %v2278_v44 }
 0x42c   : > { %2195 = vmatprep.subr.bf16.mxu1 %v2385_v1 }
 0x4be   : > { %v1356_v16 = vpop.f32.mrf.mxu1 }
 0x4bf   : > { %v1500_v35 = vpack.c.bf16 %v1356_v16, %v1356_v16 }
 0x4c0   : > { %v2159_v17 = vpop.f32.mrf.mxu1  ;;  %v1402_v46 = vpop.f32.mrf.mxu0 }
 0x4c1   : > { %v1534_v51 = vpack.c.bf16 %v1402_v46, %v1402_v46  ;;  %v1507_v60 = vrot.slane %v1500_v35, %v2578_v21 }
 0x4c2   : > { %v1359_v47 = vpop.f32.mrf.mxu1  ;;  %v2165_v18 = vpop.f32.mrf.mxu0 }
 0x4c3   : > { %v1541_v55 = vrot.slane %v1534_v51, %v2578_v21 }
 0x4c4   : > { %v2160_v48 = vpop.f32.mrf.mxu1  ;;  %v1405_v49 = vpop.f32.mrf.mxu0 }
 0x4c6   : > { %v2166_v50 = vpop.f32.mrf.mxu0 }
 0x4e4   : > { %v1494_v34 = vpop.f32.mrf.mxu0 }
 0x4e5   : > { %v1542_v52 = vpack.c.bf16 %v1494_v34, %v1494_v34 }
 0x4e6   : > { %v1448_v53 = vpop.f32.mrf.mxu1  ;;  %v2177_v54 = vpop.f32.mrf.mxu0 }
 0x4e7   : > { %v1549_v56 = vrot.slane %v1542_v52, %v2578_v21  ;;  %v1508_v57 = vpack.c.bf16 %v1448_v53, %v1448_v53 }
 0x4e8   : > { %v2171_v58 = vpop.f32.mrf.mxu1  ;;  %v1497_v59 = vpop.f32.mrf.mxu0 }
 0x4e9   : > { %v1550_v61 = vcombine.low %v1541_v55, %v1549_v56  ;;  %v1551_v62 = vcombine.high %v1541_v55, %v1549_v56  ;;  %v1515_v63 = vrot.slane %v1508_v57, %v2578_v21 }
 0x4ea   : > { %v1451_v0 = vpop.f32.mrf.mxu1  ;;  %v2178_v2 = vpop.f32.mrf.mxu0 }
 0x4eb   : > { %v1558_v5 = vrot.slane %v1550_v61, %v2589_v27  ;;  %v1565_v11 = vrot.slane %v1551_v62, %v2589_v27  ;;  %v1516_v8 = vcombine.low %v1507_v60, %v1515_v63  ;;  %v1517_v7 = vcombine.high %v1507_v60, %v1515_v63  ;;  %v2071_v60 = vld [vmem:[%s2895_s5] ss:$0 sm:$0xff] }
 0x4ec   : > { %v2172_v9 = vpop.f32.mrf.mxu1  ;;  %v563_v61 = vunpack.c.l.bf16 %v2551_v3  ;;  %v2279_v3 = vld [vmem:[%s2874_s8 + $0x8] sm:$0xff]  }
 0x4ed   : > { %v1566_v10 = vcombine.high %v1558_v5, %v2393_v38  ;;  %v1524_v14 = vrot.slane %v1516_v8, %v2589_v27  ;;  %v1531_v15 = vrot.slane %v1517_v7, %v2589_v27  ;;  %v1567_v19 = vcombine.high %v1565_v11, %v2393_v38  ;;  %2188 = vmatpush3.bf16.msra.mxu0 %v2279_v3 }
 0x4ee   : > { %v1573_v13 = vshrl.u32 %v1558_v5, 16  ;;  %v1589_v25 = vshrl.u32 %v1565_v11, 16  ;;  %2189 = vmatprep.subr.bf16.mxu0 %v2385_v1 }
 0x4ef   : > { %v1532_v12 = vcombine.high %v1524_v14, %v2393_v38  ;;  %v1533_v20 = vcombine.high %v1531_v15, %v2393_v38  ;;  %v1570_v22 = vpack.i.b16 %v1558_v5, %v1524_v14  ;;  %v1572_v23 = vshrl.u32 %v1524_v14, 16 }
 0x4f0   : > { %v1581_v24 = vshrl.u32 %v1566_v10, 16  ;;  %v1586_v26 = vpack.i.b16 %v1565_v11, %v1531_v15  ;;  %v1588_v28 = vshrl.u32 %v1531_v15, 16  ;;  %v1597_v32 = vshrl.u32 %v1567_v19, 16 }
 0x4f1   : > { %v1574_v29 = vpack.i.b16 %v1573_v13, %v1572_v23  ;;  %v1578_v30 = vpack.i.b16 %v1566_v10, %v1532_v12  ;;  %v1580_v31 = vshrl.u32 %v1532_v12, 16  ;;  %v1594_v4 = vpack.i.b16 %v1567_v19, %v1533_v20  ;;  %v2280_v19 = vld [vmem:[%s2874_s8] sm:$0xff]  }
 0x4f2   : > { %v1590_v33 = vpack.i.b16 %v1589_v25, %v1588_v28  ;;  %v1596_v6 = vshrl.u32 %v1533_v20, 16  ;;  %v1600_v36 = vcombine.low %v1570_v22, %v1586_v26  ;;  %2190 = vmatpush3.bf16.msra.mxu0 %v2280_v19  ;;  %v2075_v23 = vld [vmem:[%s2896_s6] ss:$0 sm:$0xff]  ;;  %s1961_s6 = scalar_lea.sflag [#allocation3], %s481_s0 }
 0x4f3   : > { %v1582_v37 = vpack.i.b16 %v1581_v24, %v1580_v31  ;;  %v1608_v39 = vcombine.low %v1578_v30, %v1594_v4  ;;  %v2076_v25 = vld [vmem:[%s2873_s7] ss:$0 sm:$0xff]  ;;  %v2281_v30 = vld [vmem:[%s2876_s10 + $0x18] sm:$0xff]   ;;  %v2282_v31 = vld [vmem:[%s2876_s10 + $0x10] sm:$0xff]  }
 0x4f4   : > { %v1598_v40 = vpack.i.b16 %v1597_v32, %v1596_v6  ;;  %v1625_v41 = vcombine.low %v1574_v29, %v1590_v33  ;;  %v1607_v42 = vrot.slane %v1600_v36, %v2578_v21  ;;  %v2283_v4 = vld [vmem:[%s2876_s10 + $0x8] sm:$0xff]   ;;  %v2284_v32 = vld [vmem:[%s2876_s10] sm:$0xff]  }
 0x4f5   : > { %v1615_v43 = vrot.slane %v1608_v39, %v2578_v21  ;;  %v2077_v33 = vld [vmem:[%s2875_s9] ss:$0 sm:$0xff] }
 0x4f6   : > { %v1633_v45 = vcombine.low %v1582_v37, %v1598_v40  ;;  %v1632_v17 = vrot.slane %v1625_v41, %v2578_v21 }
 0x4f7   : > { %v1616_v16 = vcombine.low %v1607_v42, %v1615_v43 }
 0x4f8   : > { %v1640_v46 = vrot.slane %v1633_v45, %v2578_v21 }
 0x4f9   : > { %v1623_v47 = vrot.slane %v1616_v16, %v2589_v27  ;;  %v2081_v16 = vld [vmem:[%s2877_s11] ss:$0 sm:$0xff] }
 0x4fa   : > { %v1641_v18 = vcombine.low %v1632_v17, %v1640_v46 }
 0x4fb   : > { %v1653_v49 = vshrl.u32 %v1623_v47, 16  ;;  %v1624_v51 = vcombine.high %v1623_v47, %v2393_v38 }
 0x4fc   : > { %v1648_v48 = vrot.slane %v1641_v18, %v2589_v27 }
 0x4fd   : > { %v1659_v21 = vshrl.u32 %v1624_v51, 16 }
 0x4fe   : > { %v1654_v50 = vshrl.u32 %v1648_v48, 16  ;;  %v1649_v34 = vcombine.high %v1648_v48, %v2393_v38  ;;  %v1652_v35 = vpack.i.b16 %v1648_v48, %v1623_v47 }
 0x500   : > { %v1655_v52 = vpack.i.b16 %v1654_v50, %v1653_v49  ;;  %v1658_v53 = vpack.i.b16 %v1649_v34, %v1624_v51  ;;  %v1660_v54 = vshrl.u32 %v1649_v34, 16 }
 0x502   : > { %1662 = vrot.lane.b32.xlu0 %v1655_v52, %s2395_s20  ;;  %1664 = vrot.lane.b32.xlu1 %v1658_v53, %s2396_s24  ;;  %v1661_v55 = vpack.i.b16 %v1660_v54, %v1659_v21  ;;  %s2090_s24 = sshll.u32 %s2375_s16, 7  ;;  %s2313_s16 = scalar_lea.vmem %s2312_s2, 256 }
 0x503   : > { %s1973_s5 = scalar_lea.hbm %s2880_s14, %s2090_s24 }
 0x506   : > { %1666 = vrot.lane.b32.xlu1 %v1661_v55, %s2397_s22  ;;  %s483_s22 = scalar_lea.vmem [#allocation2], %s2057_s27 }
 0x507   : > { %s1975_s1 = sshll.u32 %s483_s22, 4  ;;  %s1976_s1 = int_to_ptr.vmem [resolvable:$true] %s1975_s1 }
 0x508   : > { %s2307_s28 = scalar_lea.vmem %s1976_s1, 128  ;;  %p2314_p1 = scmp.lt.s32.totalorder %s1976_s1, %s2312_s2 }
 0x509   : > { %p2308_p12 = scmp.ne.s32.totalorder %s1976_s1, %s2307_s28  ;;  %p2315_p2 = scmp.lt.s32.totalorder %s2313_s16, %s2307_s28 }
 0x50b   : > { %p2309_p13 = pnand %p2308_p12, %p2514_p4  ;;  %p2316_p3 = por %p2315_p2, %p2314_p1 }
 0x50d   : > { %p2310_p0 = pneg %p2309_p13 }
 0x50f   : > { %p2317_p5 = pnand %p2316_p3, %p2310_p0 }
 0x574   : > { %v1663_v56 = vpop.permute.xlu0 %1662  ;;  %v1665_v27 = vpop.permute.xlu1 %1664 }
 0x575   : > { %v1670_v57 = vsel %vm1072_vm2, %v1652_v35, %v1663_v56 }
 0x576   : > { %v1673_v58 = vsel %vm1671_vm6, %v1670_v57, %v1665_v27  ;;  %v2087_v27 = vld [vmem:[%s2878_s12] ss:$0 sm:$0xff] }
 0x578   : > { %v1667_v38 = vpop.permute.xlu1 %1666 }
 0x579   : > { %v1676_v59 = vsel %vm1674_vm7, %v1673_v58, %v1667_v38  ;;  %v2088_v58 = vld [vmem:[%s2879_s13] ss:$0 sm:$0xff] }
 0x57a   : > { %2184 = vmatmul.mubr.msk.bf16.vlgmr.msra.gmra.mxu1 %vm518_vm1, %v1676_v59 }
 0x57b   : > { %2203 = vmatprep.mubr.msk.bf16.mxu1 %vm2386_vm0, %v2385_v1  ;;  %2196 = vmatpush3.bf16.msra.mxu1 %v2281_v30 }
 0x57c   : > { %2197 = vmatprep.subr.bf16.mxu1 %v2385_v1 }
 0x57f   : > { %2198 = vmatpush3.bf16.msra.mxu1 %v2282_v31 }
 0x580   : > { %2199 = vmatprep.subr.bf16.mxu1 %v2385_v1 }
 0x583   : > { %2200 = vmatpush3.bf16.msra.mxu1 %v2283_v4 }
 0x584   : > { %2201 = vmatprep.subr.bf16.mxu1 %v2385_v1 }
 0x587   : > { %2202 = vmatpush3.bf16.msra.mxu1 %v2284_v32 }
 0x63a   : > { %v1736_v62 = vpop.f32.mrf.mxu1 }
 0x63b   : > { %v1737_v63 = vadd.f32 %v2071_v60, %v1736_v62 }
 0x63c   : > { %v2185_v0 = vpop.f32.mrf.mxu1 }
 0x63d   : > { %v1742_v2 = vadd.f32 %v1737_v63, %v563_v61 }
 0x63e   : > { %v1739_v5 = vpop.f32.mrf.mxu1 }
 0x63f   : > { %v1745_v11 = vsel %vm518_vm1, %v1742_v2, 0.0 }
 0x640   : > { %1746 = vadd.xlane.f32.xlu0 %v1745_v11  ;;  %v2186_v8 = vpop.f32.mrf.mxu1 }
 0x6c9   : > { %v1747_v7 = vpop.xlane.xlu0 %1746 }
 0x6ca   : > { %v1749_v9 = vmul.f32 0.03125, %v1747_v7 }
 0x6cc   : > { %v1750_v10 = vsub.f32 %v1742_v2, %v1749_v9 }
 0x6ce   : > { %v1751_v14 = vmul.f32 %v1750_v10, %v1750_v10 }
 0x6d0   : > { %v1752_v15 = vsel %vm518_vm1, %v1751_v14, 0.0 }
 0x6d1   : > { %1753 = vadd.xlane.f32.xlu1 %v1752_v15 }
 0x75a   : > { %v1754_v13 = vpop.xlane.xlu1 %1753 }
 0x75b   : > { %v1755_v12 = vmul.f32 0.03125, %v1754_v13 }
 0x75d   : > { %v1756_v20 = vadd.f32 1e-12, %v1755_v12 }
 0x75f   : > { %2301 = vrsqrt.f32 %v1756_v20 }
 0x76c   : > { %v2302_v22 = vpop.eup %2301 }
 0x76d   : > { %v1758_v24 = vmul.f32 %v2302_v22, %v1750_v10 }
 0x76f   : > { %v1765_v26 = vmul.f32 %v2075_v23, %v1758_v24 }
 0x771   : > { %v1772_v28 = vadd.f32 %v2076_v25, %v1765_v26 }
 0x773   : > { %v1773_v29 = vpack.c.bf16 %v1772_v28, %v1772_v28 }
 0x775   : > { %2192 = vmatmul.mubr.msk.bf16.vlgmr.msra.gmra.mxu0 %vm518_vm1, %v1773_v29 }
 0x835   : > { %v1834_v6 = vpop.f32.mrf.mxu0 }
 0x836   : > { %v1835_v36 = vadd.f32 %v2077_v33, %v1834_v6 }
 0x837   : > { %v2193_v37 = vpop.f32.mrf.mxu0 }
 0x838   : > { %v1841_v39 = vmul.f32 0.70710677, %v1835_v36  ;;  %v1840_v43 = vmul.f32 0.5, %v1835_v36 }
 0x839   : > { %v1837_v40 = vpop.f32.mrf.mxu0 }
 0x83a   : > { %2303 = verf.f32 %v1841_v39 }
 0x83b   : > { %v2194_v41 = vpop.f32.mrf.mxu0 }
 0x847   : > { %v2304_v42 = vpop.eup %2303 }
 0x848   : > { %v1843_v44 = vadd.f32 1.0, %v2304_v42 }
 0x84a   : > { %v1844_v1 = vmul.f32 %v1843_v44, %v1840_v43 }
 0x84c   : > { %v1845_v45 = vpack.c.bf16 %v1844_v1, %v1844_v1 }
 0x84e   : > { %2204 = vmatmul.mubr.msk.bf16.vlgmr.msra.gmra.mxu1 %vm1885_vm8, %v1845_v45 }
 0x90e   : > { %v1923_v17 = vpop.f32.mrf.mxu1 }
 0x90f   : > { %v1924_v46 = vadd.f32 %v2081_v16, %v1923_v17 }
 0x910   : > { %v2205_v47 = vpop.f32.mrf.mxu1 }
 0x911   : > { %v1929_v18 = vadd.f32 %v1924_v46, %v1772_v28 }
 0x912   : > { %v1926_v48 = vpop.f32.mrf.mxu1 }
 0x913   : > { %v1932_v49 = vsel %vm518_vm1, %v1929_v18, 0.0 }
 0x914   : > { %1933 = vadd.xlane.f32.xlu0 %v1932_v49  ;;  %v2206_v50 = vpop.f32.mrf.mxu1 }
 0x99d   : > { %v1934_v51 = vpop.xlane.xlu0 %1933 }
 0x99e   : > { %v1935_v34 = vmul.f32 0.03125, %v1934_v51 }
 0x9a0   : > { %v1936_v35 = vsub.f32 %v1929_v18, %v1935_v34 }
 0x9a2   : > { %v1937_v52 = vmul.f32 %v1936_v35, %v1936_v35 }
 0x9a4   : > { %v1938_v53 = vsel %vm518_vm1, %v1937_v52, 0.0 }
 0x9a5   : > { %1939 = vadd.xlane.f32.xlu0 %v1938_v53 }
 0xa2e   : > { %v1940_v54 = vpop.xlane.xlu0 %1939 }
 0xa2f   : > { %v1941_v21 = vmul.f32 0.03125, %v1940_v54 }
 0xa31   : > { %v1942_v55 = vadd.f32 1e-12, %v1941_v21 }
 0xa33   : > { %2305 = vrsqrt.f32 %v1942_v55 }
 0xa40   : > { %v2306_v56 = vpop.eup %2305 }
 0xa41   : > { %v1944_v57 = vmul.f32 %v2306_v56, %v1936_v35 }
 0xa43   : > { %v1951_v38 = vmul.f32 %v2087_v27, %v1944_v57 }
 0xa45   : > { %v1958_v59 = vadd.f32 %v2088_v58, %v1951_v38 }
 0xa47   : > { %1959 = vst.msk [vmem:[%s483_s22] sm:$0xff] %vm518_vm1, %v1958_v59 }
 0xa48   : > { %2320 = shalt.err (!%p2317_p5)
}
 0xa49   : > { %s2321_s3 = scalar_lea.hbm %s1973_s5, 128  ;;  %s2325_s27 = scalar_lea.hbm %s2880_s14, 256 }
 0xa4a   : > { %p2322_p6 = scmp.ne.s32.totalorder %s1973_s5, %s2321_s3  ;;  %p2326_p10 = scmp.lt.s32.totalorder %s1973_s5, %s2880_s14 }
 0xa4b   : > { %p2327_p11 = scmp.lt.s32.totalorder %s2325_s27, %s2321_s3 }
 0xa4c   : > { %p2323_p7 = pnand %p2322_p6, %p2514_p4 }
 0xa4d   : > { %p2328_p12 = por %p2327_p11, %p2326_p10 }
 0xa4e   : > { %p2324_p9 = pneg %p2323_p7 }
 0xa50   : > { %p2329_p13 = pnand %p2328_p12, %p2324_p9 }
 0xa52   : > { %2332 = shalt.err (!%p2329_p13)
}
 0xa53   : > { %2207 = dma.vmem_to_hbm [thread:$0]  (%p2514_p4), %s1976_s1, 128, %s1973_s5, %s1961_s6  }
 0xa54 PF: > { %p2213_p0 = scmp.ge.s32.totalorder %s2383_s18, 2  ;;  %s1987_s22 = sand.u32 1, %s2363_s29  }
 0xa55   : > { %s1988_s28 = scalar_lea.sflag [#allocation3], %s1987_s22 }
 0xa56   : > { %p2210_p1 = pnand %p2213_p0, %p2521_p8 }
 0xa58   : > { %p2211_p2 = pneg %p2210_p1 }
 0xa5a   : > { %2358 = dma.done.wait (%p2211_p2), %s1988_s28, 128  }
 0xa5b   : > { %2360 = vsyncadd (%p2211_p2), %s1988_s28, 4294967168  ;;  %s27_s18 = sadd.s32 1, %s2383_s18   ;;  %s2897_s29 = smov %s2367_s30 }
 0xa5c   : > { %p24_p3 = scmp.ge.s32.totalorder %s27_s18, 4   ;;  %s2898_s30 = smov %s2371_s15 }
 0xa5d   : > { %s2899_s15 = smov %s2527_s26  ;;  %s2900_s16 = smov %s2379_s17 }
 0xa5e   : > { %s2901_s17 = smov %s2903_s21  ;;  %26 = sbr.rel (!%p24_p3) target bundleno = 12 (0xc), region = 114 }
 0xa63   :  { %1993 = vsyncpa [#allocation3], 1 }
 0xa64   :  { %1995 = vsyncpa [#allocation3 + $0x1], 1 }

// kernel: distilbert_transformer.2
= control target key start
LH: loop header
LB: loop body
LE: loop exit
PB: predicated region body
PF: predicated region fallthrough
CT: control target
= control target key end

     0   :  { %s3421_s0 = inlined_call_operand.vmem [shape: f32[2,8,32], index: 0, kind: input, shape index: {}]   ;;  %s3422_s1 = inlined_call_operand.hbm [shape: f32[2,1,8], index: 1, kind: input, shape index: {}]   ;;  %s3423_s2 = inlined_call_operand.vmem [shape: bf16[32,96], index: 2, kind: input, shape index: {}]   ;;  %s3424_s3 = inlined_call_operand.hbm [shape: f32[1,96], index: 3, kind: input, shape index: {}]   ;;  %s3425_s4 = inlined_call_operand.vmem [shape: bf16[32,32], index: 4, kind: input, shape index: {}]   ;;  %s3426_s5 = inlined_call_operand.hbm [shape: f32[1,32], index: 5, kind: input, shape index: {}]   ;;  %s3427_s6 = inlined_call_operand.hbm [shape: f32[1,32], index: 6, kind: input, shape index: {}]   ;;  %s3428_s7 = inlined_call_operand.hbm [shape: f32[1,32], index: 7, kind: input, shape index: {}]   ;;  %s3429_s8 = inlined_call_operand.vmem [shape: bf16[32,64], index: 8, kind: input, shape index: {}]   ;;  %s3430_s9 = inlined_call_operand.hbm [shape: f32[1,64], index: 9, kind: input, shape index: {}]   ;;  %s3431_s10 = inlined_call_operand.vmem [shape: bf16[64,32], index: 10, kind: input, shape index: {}]   ;;  %s3432_s11 = inlined_call_operand.hbm [shape: f32[1,32], index: 11, kind: input, shape index: {}]   ;;  %s3433_s12 = inlined_call_operand.vmem [shape: f32[1,32], index: 12, kind: input, shape index: {}]   ;;  %s3434_s13 = inlined_call_operand.hbm [shape: f32[1,32], index: 13, kind: input, shape index: {}]   ;;  %s3435_s14 = inlined_call_operand.vmem [shape: bf16[2,8,32], index: 14, kind: output, shape index: {}]  }
   0x1   :  { %3440 = sst [smem:[#allocation20_spill]] %s3424_s3 }
   0x2   :  { %3441 = sst [smem:[#allocation21_spill]] %s3426_s5 }
   0x3   :  { %3442 = sst [smem:[#allocation22_spill]] %s3427_s6 }
   0x4   :  { %3443 = sst [smem:[#allocation23_spill]] %s3428_s7 }
   0x5   :  { %3444 = sst [smem:[#allocation24_spill]] %s3431_s10 }
   0x6   :  { %3445 = sst [smem:[#allocation25_spill]] %s3433_s12 }
   0x7   :  { %3446 = sst [smem:[#allocation26_spill]] %s3435_s14 }
   0x8   :  { %19 = vsyncpa [#allocation3], 0 }
   0x9   :  { %21 = vsyncpa [#allocation3 + $0x1], 0 }
   0xa   :  { %22 = vsyncpa [#allocation5], 0 }
   0xb   :  { %23 = vsyncpa [#allocation8], 0 }
   0xc   :  { %24 = vsyncpa [#allocation11], 0 }
   0xd   :  { %25 = vsyncpa [#allocation14], 0  ;;  %s2948_s29 = smov 0   ;;  %s2950_s30 = smov 0  }
   0xe   :  { %s2952_s15 = smov 0   ;;  %s2954_s16 = smov 0  }
   0xf   :  { %s2956_s17 = smov 0   ;;  %s2958_s18 = smov 0  }
  0x10 LB: > { %s2235_s19 = sadd.s32 4294967295, %s2850_s18   ;;  %p2237_p0 = scmp.ge.s32.totalorder %s2850_s18, 1  ;;  %s2850_s18 = sphi %s2958_s18, %s31_s18   ;;  %s2846_s17 = sphi %s2956_s17, %s3468_s17   ;;  %s2842_s16 = sphi %s2954_s16, %s3467_s16   ;;  %s2838_s15 = sphi %s2952_s15, %s3466_s15   ;;  %s2834_s30 = sphi %s2950_s30, %s3465_s30   ;;  %s2830_s29 = sphi %s2948_s29, %s3464_s29  }
  0x11   : > { %p2980_p1 = scmp.eq.s32.totalorder %s2235_s19, 0  ;;  %p380_p2 = scmp.lt.s32.totalorder %s2850_s18, 3 }
  0x12   : > { %s2852_s22 = smov [#allocation4]   ;;  %s2853_s24 = smov [#allocation7]  }
  0x13   : > { %s3447_s20 = scalar_select %p2980_p1, 1, 0 }
  0x14   : > { %p2985_p3 = pnand %p2237_p0, %p380_p2  ;;  %s396_s23 = sshll.u32 %s2852_s22, 4  ;;  %s397_s23 = int_to_ptr.vmem [resolvable:$true] %s396_s23 }
  0x15   : > { %s421_s25 = sshll.u32 %s2853_s24, 4  ;;  %s2854_s27 = smov [#allocation10]   ;;  %s422_s25 = int_to_ptr.vmem [resolvable:$true] %s421_s25 }
  0x16   : > { %s3448_s21 = scalar_select %p2985_p3, 1, 0 }
  0x17   : > { %p2433_p4 = pneg %p2985_p3  ;;  %s446_s28 = sshll.u32 %s2854_s27, 4  ;;  %s2997_s28 = int_to_ptr.vmem [resolvable:$true] %s446_s28 }
  0x18   : > { %s2585_s22 = scalar_lea.vmem %s397_s23, 16  ;;  %s2592_s24 = scalar_lea.vmem %s397_s23, 32 }
  0x19   : > { %p2993_p5 = pnand %p2433_p4, %p2980_p1  ;;  %p2586_p7 = scmp.ne.s32.totalorder %s397_s23, %s2585_s22 }
  0x1a   : > { %p2593_p10 = scmp.lt.s32.totalorder %s397_s23, %s397_s23  ;;  %p2594_p11 = scmp.lt.s32.totalorder %s2592_s24, %s2585_s22 }
  0x1b   : > { %p3001_p6 = pneg %p2993_p5 }
  0x1c   : > { %p2595_p12 = por %p2594_p11, %p2593_p10 }
  0x1d   : > { %p2588_p8 = pnand %p2586_p7, %p3001_p6 }
  0x1f   : > { %p2589_p9 = pneg %p2588_p8 }
  0x21   : > { %p2596_p13 = pnand %p2595_p12, %p2589_p9 }
  0x23   : > { %2599 = shalt.err (!%p2596_p13)
}
  0x24   : > { %s3451_s3 = sld [smem:[#allocation20_spill]]  ;;  %s2611_s12 = scalar_lea.vmem %s422_s25, 16 }
  0x25   : > { %p2612_p0 = scmp.ne.s32.totalorder %s422_s25, %s2611_s12  ;;  %s2618_s10 = scalar_lea.vmem %s422_s25, 32 }
  0x26   : > { %p2619_p7 = scmp.lt.s32.totalorder %s422_s25, %s422_s25  ;;  %p2620_p8 = scmp.lt.s32.totalorder %s2618_s10, %s2611_s12 }
  0x27   : > { %p2614_p2 = pnand %p2612_p0, %p3001_p6 }
  0x28   : > { %p2621_p3 = por %p2620_p8, %p2619_p7 }
  0x29   : > { %p2615_p4 = pneg %p2614_p2 }
  0x2a   : > { %2436 = dma.hbm_to_vmem [thread:$0]  (!%p2993_p5), %s3451_s3, 16, %s397_s23, [#allocation5]  }
  0x2b   : > { %p2622_p1 = pnand %p2621_p3, %p2615_p4 }
  0x2d   : > { %2625 = shalt.err (!%p2622_p1)
}
  0x2e   : > { %s3452_s6 = sld [smem:[#allocation22_spill]]  ;;  %s2637_s14 = scalar_lea.vmem %s2997_s28, 16 }
  0x2f   : > { %p2638_p9 = scmp.ne.s32.totalorder %s2997_s28, %s2637_s14  ;;  %s2644_s10 = scalar_lea.vmem %s2997_s28, 32 }
  0x30   : > { %p2645_p3 = scmp.lt.s32.totalorder %s2997_s28, %s2997_s28  ;;  %p2646_p1 = scmp.lt.s32.totalorder %s2644_s10, %s2637_s14 }
  0x31   : > { %p2640_p10 = pnand %p2638_p9, %p3001_p6 }
  0x32   : > { %p2647_p12 = por %p2646_p1, %p2645_p3 }
  0x33   : > { %p2641_p11 = pneg %p2640_p10 }
  0x34   : > { %2442 = dma.hbm_to_vmem [thread:$0]  (!%p2993_p5), %s3452_s6, 16, %s422_s25, [#allocation8]  }
  0x35   : > { %p2648_p13 = pnand %p2647_p12, %p2641_p11 }
  0x37   : > { %2651 = shalt.err (!%p2648_p13)
}
  0x38   : > { %2448 = dma.hbm_to_vmem [thread:$0]  (!%p2993_p5), %s3430_s9, 16, %s2997_s28, [#allocation11]  }
  0x39   : > { %s2855_s25 = smov [#allocation6]   ;;  %s2856_s22 = smov [#allocation9]  }
  0x3a   : > { %s410_s27 = sshll.u32 %s2855_s25, 4  ;;  %s432_s24 = sshll.u32 %s2856_s22, 4  ;;  %s411_s27 = int_to_ptr.vmem [resolvable:$true] %s410_s27  ;;  %s433_s24 = int_to_ptr.vmem [resolvable:$true] %s432_s24 }
  0x3b   : > { %s2663_s3 = scalar_lea.vmem %s411_s27, 16  ;;  %s2670_s14 = scalar_lea.vmem %s411_s27, 32 }
  0x3c   : > { %p2664_p0 = scmp.ne.s32.totalorder %s411_s27, %s2663_s3  ;;  %p2671_p7 = scmp.lt.s32.totalorder %s411_s27, %s411_s27 }
  0x3d   : > { %p2672_p8 = scmp.lt.s32.totalorder %s2670_s14, %s2663_s3 }
  0x3e   : > { %p2666_p2 = pnand %p2664_p0, %p3001_p6 }
  0x3f   : > { %p2673_p9 = por %p2672_p8, %p2671_p7 }
  0x40   : > { %p2667_p4 = pneg %p2666_p2 }
  0x42   : > { %p2674_p10 = pnand %p2673_p9, %p2667_p4 }
  0x44   : > { %2677 = shalt.err (!%p2674_p10)
}
  0x45   : > { %s3453_s5 = sld [smem:[#allocation21_spill]]  ;;  %s2689_s12 = scalar_lea.vmem %s433_s24, 16 }
  0x46   : > { %p2690_p11 = scmp.ne.s32.totalorder %s433_s24, %s2689_s12  ;;  %s2696_s23 = scalar_lea.vmem %s433_s24, 32 }
  0x47   : > { %p2697_p12 = scmp.lt.s32.totalorder %s433_s24, %s433_s24  ;;  %p2698_p13 = scmp.lt.s32.totalorder %s2696_s23, %s2689_s12 }
  0x48   : > { %p2692_p3 = pnand %p2690_p11, %p3001_p6 }
  0x49   : > { %p2699_p0 = por %p2698_p13, %p2697_p12 }
  0x4a   : > { %p2693_p1 = pneg %p2692_p3 }
  0x4b   : > { %2439 = dma.hbm_to_vmem [thread:$0]  (!%p2993_p5), %s3453_s5, 16, %s411_s27, [#allocation5]  }
  0x4c   : > { %p2700_p2 = pnand %p2699_p0, %p2693_p1 }
  0x4e   : > { %2703 = shalt.err (!%p2700_p2)
}
  0x4f   : > { %s3454_s7 = sld [smem:[#allocation23_spill]]  ;;  %s2857_s27 = smov [#allocation12]  }
  0x50   : > { %s460_s22 = sshll.u32 %s2857_s27, 4  ;;  %s2858_s14 = smov [#allocation13]   ;;  %s461_s22 = int_to_ptr.vmem [resolvable:$true] %s460_s22 }
  0x51   : > { %s474_s10 = sshll.u32 %s2858_s14, 4  ;;  %s2715_s28 = scalar_lea.vmem %s461_s22, 16  ;;  %s475_s10 = int_to_ptr.vmem [resolvable:$true] %s474_s10 }
  0x52   : > { %p2716_p4 = scmp.ne.s32.totalorder %s461_s22, %s2715_s28  ;;  %s2722_s12 = scalar_lea.vmem %s461_s22, 32 }
  0x53   : > { %p2723_p9 = scmp.lt.s32.totalorder %s461_s22, %s461_s22  ;;  %p2724_p10 = scmp.lt.s32.totalorder %s2722_s12, %s2715_s28 }
  0x54   : > { %p2718_p7 = pnand %p2716_p4, %p3001_p6 }
  0x55   : > { %2445 = dma.hbm_to_vmem [thread:$0]  (!%p2993_p5), %s3454_s7, 16, %s433_s24, [#allocation8]  }
  0x56   : > { %p2719_p8 = pneg %p2718_p7  ;;  %p2725_p11 = por %p2724_p10, %p2723_p9 }
  0x58   : > { %p2726_p3 = pnand %p2725_p11, %p2719_p8 }
  0x5a   : > { %2729 = shalt.err (!%p2726_p3)
}
  0x5b   : > { %2451 = dma.hbm_to_vmem [thread:$0]  (!%p2993_p5), %s3432_s11, 16, %s461_s22, [#allocation11]  }
  0x5c   : > { %s2741_s3 = scalar_lea.vmem %s475_s10, 16  ;;  %s2748_s25 = scalar_lea.vmem %s475_s10, 32 }
  0x5d   : > { %p2742_p1 = scmp.ne.s32.totalorder %s475_s10, %s2741_s3  ;;  %p2749_p0 = scmp.lt.s32.totalorder %s475_s10, %s475_s10 }
  0x5e   : > { %p2750_p2 = scmp.lt.s32.totalorder %s2748_s25, %s2741_s3 }
  0x5f   : > { %p2744_p12 = pnand %p2742_p1, %p3001_p6 }
  0x60   : > { %p2751_p4 = por %p2750_p2, %p2749_p0 }
  0x61   : > { %p2745_p13 = pneg %p2744_p12 }
  0x63   : > { %p2752_p7 = pnand %p2751_p4, %p2745_p13 }
  0x65   : > { %2755 = shalt.err (!%p2752_p7)
}
  0x66   : > { %2454 = dma.hbm_to_vmem [thread:$0]  (!%p2993_p5), %s3434_s13, 16, %s475_s10, [#allocation14]  }
  0x67   : > { %s43_s19 = sadd.s32 1, %s2846_s17  ;;  %s76_s26 = sadd.s32 1, %s2838_s15 }
  0x68   : > { %p45_p6 = scmp.ge.s32.totalorder %s43_s19, 2  ;;  %p83_p8 = scmp.ne.s32.totalorder %s2838_s15, %s2834_s30 }
  0x69   : > { %p84_p9 = scmp.eq.s32.totalorder %s2850_s18, 0  ;;  %p89_p11 = scmp.ne.s32.totalorder %s2834_s30, %s2830_s29 }
  0x6a   : > { %s3470_s19 = smov (%p45_p6, %s43_s19), 0  ;;  %p2466_p3 = scmp.lt.s32.totalorder %s2850_s18, 2 }
  0x6b   : > { %p3067_p10 = por %p84_p9, %p83_p8  ;;  %s73_s28 = ssub.s32 %s2846_s17, %s3470_s19 }
  0x6c   : > { %p74_p1 = scmp.eq.s32.totalorder %s73_s28, 0  ;;  %p3456_p12 = scmp.ne.s32.totalorder %s3447_s20, 0 }
  0x6d   : > { %s492_s12 = sand.u32 1, %s2838_s15   ;;  %s2246_s23 = sshll.u32 %s2846_s17, 4 }
  0x6e   : > { %p3078_p13 = por %p3456_p12, %p89_p11  ;;  %s500_s27 = scalar_lea.hbm %s3422_s1, %s2246_s23 }
  0x6f   : > { %s3085_s24 = scalar_select %p74_p1, %s2838_s15, %s76_s26  }
  0x70   : > { %s495_s14 = scalar_lea.vmem [#allocation2], %s492_s12  ;;  %p3092_p5 = pnand %p2466_p3, %p3067_p10 }
  0x71   : > { %s502_s5 = sshll.u32 %s495_s14, 4  ;;  %s493_s28 = scalar_lea.sflag [#allocation3], %s492_s12  ;;  %s503_s5 = int_to_ptr.vmem [resolvable:$true] %s502_s5 }
  0x72   : > { %p2758_p0 = pneg %p3092_p5  ;;  %s2769_s6 = scalar_lea.vmem %s503_s5, 16 }
  0x73   : > { %p2770_p2 = scmp.ne.s32.totalorder %s503_s5, %s2769_s6  ;;  %s2859_s26 = smov [#allocation2]  }
  0x74   : > { %s2774_s7 = sshll.u32 %s2859_s26, 4  ;;  %s2775_s7 = int_to_ptr.vmem [resolvable:$false] %s2774_s7 }
  0x75   : > { %p2772_p4 = pnand %p2770_p2, %p2758_p0  ;;  %s2776_s23 = scalar_lea.vmem %s2775_s7, 32 }
  0x76   : > { %p2777_p6 = scmp.lt.s32.totalorder %s503_s5, %s2775_s7  ;;  %p2778_p8 = scmp.lt.s32.totalorder %s2776_s23, %s2769_s6 }
  0x77   : > { %p2773_p7 = pneg %p2772_p4 }
  0x78   : > { %p2779_p9 = por %p2778_p8, %p2777_p6 }
  0x7a   : > { %p2780_p11 = pnand %p2779_p9, %p2773_p7 }
  0x7c   : > { %2783 = shalt.err (!%p2780_p11)
}
  0x7d   : > { %2458 = dma.hbm_to_vmem [thread:$0]  (!%p3092_p5), %s500_s27, 16, %s503_s5, %s493_s28  }
  0x7e   : > { %p3459_p10 = scmp.ne.s32.totalorder %s3448_s21, 0 }
  0x7f   : > { %s513_s22 = sand.u32 (!%p3459_p10), 1, %s2834_s30  }
  0x80   : > { %511 = sbr.rel (%p3459_p10) target bundleno = 2750 (0xabe), region = 76  ;;  %s514_s12 = scalar_lea.sflag (!%p3459_p10), [#allocation3], %s513_s22 }
  0x81   : > { %s3103_s3 = scalar_lea.vmem (!%p3459_p10), [#allocation2], %s513_s22 }
  0x85   : > { %2809 = dma.done.wait (%p3078_p13), %s514_s12, 16  }
  0x86   : > { %2811 = vsyncadd (%p3078_p13), %s514_s12, 4294967280  ;;  %p3460_p3 = scmp.ne.s32.totalorder %s3447_s20, 0 }
  0x88   : > { %2813 = dma.done.wait (%p3460_p3), [#allocation5], 32  }
  0x89   : > { %2815 = vsyncadd (%p3460_p3), [#allocation5], 4294967264 }
  0x8a   : > { %2817 = dma.done.wait (%p3460_p3), [#allocation8], 32  }
  0x8b   : > { %2819 = vsyncadd (%p3460_p3), [#allocation8], 4294967264 }
  0x8c   : > { %2821 = dma.done.wait (%p3460_p3), [#allocation11], 32  }
  0x8d   : > { %2823 = vsyncadd (%p3460_p3), [#allocation11], 4294967264 }
  0x8e   : > { %2825 = dma.done.wait (%p3460_p3), [#allocation14], 16  }
  0x8f   : > { %2827 = vsyncadd (%p3460_p3), [#allocation14], 4294967280  ;;  %p594_p1 = scmp.lt.s32.totalorder %s2842_s16, 1  ;;  %v2860_v0 = vmov 0.0   ;;  %vm2861_vm0 = vmmov 0   ;;  %v2542_v1 = vld [vmem:[%s3423_s2 + $0x8] sm:$0xff]   ;;  %v688_v17 = vlaneseq }
  0x90   : > { %2319 = vmatprep.subr.bf16.mxu0 %v2860_v0  ;;  %2323 = vmatprep.mubr.msk.bf16.mxu0 %vm2861_vm0, %v2860_v0  ;;  %v2543_v2 = vld [vmem:[%s3423_s2] sm:$0xff]   ;;  %vm633_vm1 = vcmask 261120   ;;  %s2862_s14 = smov 104   ;;  %s2863_s29 = smov 120   ;;  %v2866_v15 = vmov 1983009808  }
  0x91   : > { %s3472_s16 = smov (!%p594_p1, %s2842_s16), 1  ;;  %2327 = vmatprep.subr.bf16.mxu1 %v2860_v0  ;;  %2329 = vmatprep.mubr.msk.bf16.mxu1 %vm2861_vm0, %v2860_v0  ;;  %v2257_v5 = vld [vmem:[#allocation4] ss:$0 sm:$0xff]  ;;  %s2864_s28 = smov 96   ;;  %v686_v16 = vunpack.c.l.s4 %v2866_v15  ;;  %v3169_v19 = vshrl.u32 %v688_v17, 7  ;;  %v2868_v39 = vmov 0  }
  0x92   : > { %s2255_s5 = sshll.u32 %s3472_s16, 3  ;;  %2320 = vmatpush3.bf16.msra.mxu0 %v2542_v1  ;;  %s2865_s26 = smov 112   ;;  %v2867_v20 = vmov 1934713408   ;;  %vm1186_vm2 = vcmask 64512   ;;  %vm1432_vm5 = vcmask 1043456  }
  0x93   : > { %s597_s20 = scalar_lea.vmem %s3421_s0, %s2255_s5  ;;  %2321 = vmatprep.subr.bf16.mxu0 %v2860_v0  ;;  %v687_v18 = vunpack.c.0.s8 %v686_v16  ;;  %v703_v21 = vunpack.c.l.s4 %v2867_v20  ;;  %s2869_s23 = smov 64   ;;  %vm1785_vm6 = vcmask 130048   ;;  %vm1788_vm7 = vcmask 195584  }
  0x94   : > { %v3145_v3 = vld [vmem:[%s597_s20] sm:$0xff]  ;;  %s2870_s6 = smov 8   ;;  %s2871_s7 = smov 16   ;;  %vm1999_vm8 = vcmask 523264   ;;  %vm2074_vm9 = vcmask 257024  }
  0x95   : > { %v609_v4 = vpack.c.bf16 %v3145_v3, %v3145_v3  ;;  %v3172_v22 = vsub.s32 %v687_v18, %v3169_v19  ;;  %v704_v24 = vunpack.c.0.s8 %v703_v21  ;;  %s2872_s20 = smov 24   ;;  %s2256_s21 = sshll.u32 %s3472_s16, 2 }
  0x96   : > { %2322 = vmatpush3.bf16.msra.mxu0 %v2543_v2  ;;  %s3463_s27 = sld [smem:[#allocation26_spill]] }
  0x97   : > { %2333 = vmatprep.subr.bf16.mxu0 %v2860_v0  ;;  %v3183_v28 = vsub.s32 %v704_v24, %v3169_v19 }
  0x99   : > { %2324 = vmatmul.mubr.msk.bf16.vlgmr.msra.gmra.mxu0 %vm633_vm1, %v609_v4 }
  0x9a   : > { %2335 = vmatprep.mubr.msk.bf16.mxu0 %vm2861_vm0, %v2860_v0 }
 0x159   : > { %v671_v6 = vpop.f32.mrf.mxu0 }
 0x15a   : > { %v672_v7 = vadd.f32 %v2257_v5, %v671_v6 }
 0x15b   : > { %v2325_v8 = vpop.f32.mrf.mxu0 }
 0x15c   : > { %v3154_v9 = vpack.c.bf16 %v672_v7, %v672_v7 }
 0x15d   : > { %v674_v10 = vpop.f32.mrf.mxu0 }
 0x15e   : > { %683 = vrot.lane.b32.xlu1 %v3154_v9, %s2862_s14  ;;  %679 = vrot.lane.b32.xlu0 %v3154_v9, %s2863_s29  ;;  %v691_v27 = vrot.slane %v3154_v9, %v3172_v22  ;;  %s604_s14 = scalar_lea.vmem %s3463_s27, %s2256_s21 }
 0x15f   : > { %v2326_v11 = vpop.f32.mrf.mxu0 }
 0x162   : > { %846 = vrot.lane.b32.xlu1 %v3154_v9, %s2864_s28  ;;  %681 = vrot.lane.b32.xlu0 %v3154_v9, %s2865_s26 }
 0x1d0   : > { %v3160_v12 = vpop.permute.xlu0 %679  ;;  %v3163_v13 = vpop.permute.xlu1 %683 }
 0x1d1   : > { %848 = vrot.lane.b32.xlu0 %v3160_v12, %s2864_s28  ;;  %v733_v23 = vrot.slane %v3163_v13, %v3172_v22  ;;  %v725_v25 = vrot.slane %v3160_v12, %v3172_v22 }
 0x1d3   : > { %v734_v29 = vcombine.low %v725_v25, %v733_v23  ;;  %v735_v32 = vcombine.high %v725_v25, %v733_v23 }
 0x1d4   : > { %v3165_v14 = vpop.permute.xlu0 %681  ;;  %v847_v38 = vpop.permute.xlu1 %846 }
 0x1d5   : > { %852 = vrot.lane.b32.xlu0 %v3163_v13, %s2864_s28  ;;  %850 = vrot.lane.b32.xlu1 %v3165_v14, %s2864_s28  ;;  %v699_v26 = vrot.slane %v3165_v14, %v3172_v22  ;;  %v3186_v33 = vrot.slane %v734_v29, %v3183_v28  ;;  %v3195_v36 = vrot.slane %v735_v32, %v3183_v28  ;;  %s3461_s28 = sld [smem:[#allocation24_spill]] }
 0x1d6   : > { %v861_v45 = vrot.slane %v847_v38, %v3172_v22 }
 0x1d7   : > { %v700_v30 = vcombine.low %v691_v27, %v699_v26  ;;  %v701_v31 = vcombine.high %v691_v27, %v699_v26  ;;  %v750_v40 = vcombine.high %v3186_v33, %v2868_v39  ;;  %v751_v43 = vcombine.high %v3195_v36, %v2868_v39 }
 0x1d8   : > { %v757_v44 = vshrl.u32 %v3186_v33, 16  ;;  %v773_v48 = vshrl.u32 %v3195_v36, 16 }
 0x1d9   : > { %v3189_v34 = vrot.slane %v700_v30, %v3183_v28  ;;  %v3192_v35 = vrot.slane %v701_v31, %v3183_v28  ;;  %v765_v53 = vshrl.u32 %v750_v40, 16  ;;  %v781_v57 = vshrl.u32 %v751_v43, 16 }
 0x1db   : > { %v716_v41 = vcombine.high %v3189_v34, %v2868_v39  ;;  %v717_v42 = vcombine.high %v3192_v35, %v2868_v39  ;;  %v756_v46 = vshrl.u32 %v3189_v34, 16  ;;  %v772_v49 = vshrl.u32 %v3192_v35, 16 }
 0x1dc   : > { %v754_v58 = vpack.i.b16 %v3186_v33, %v3189_v34  ;;  %v770_v34 = vpack.i.b16 %v3195_v36, %v3192_v35 }
 0x1dd   : > { %v764_v54 = vshrl.u32 %v716_v41, 16  ;;  %v780_v55 = vshrl.u32 %v717_v42, 16  ;;  %v758_v61 = vpack.i.b16 %v757_v44, %v756_v46  ;;  %v762_v62 = vpack.i.b16 %v750_v40, %v716_v41 }
 0x1de   : > { %v774_v2 = vpack.i.b16 %v773_v48, %v772_v49  ;;  %v778_v4 = vpack.i.b16 %v751_v43, %v717_v42  ;;  %v784_v49 = vcombine.low %v754_v58, %v770_v34  ;;  %v1374_v34 = vsub.s32 0, %v3169_v19 }
 0x1df   : > { %v766_v7 = vpack.i.b16 %v765_v53, %v764_v54  ;;  %v782_v8 = vpack.i.b16 %v781_v57, %v780_v55 }
 0x1e0   : > { %v792_v44 = vcombine.low %v762_v62, %v778_v4  ;;  %v791_v58 = vrot.slane %v784_v49, %v3172_v22 }
 0x1e1   : > { %v817_v43 = vcombine.low %v766_v7, %v782_v8 }
 0x1e2   : > { %v799_v54 = vrot.slane %v792_v44, %v3172_v22 }
 0x1e3   : > { %v824_v36 = vrot.slane %v817_v43, %v3172_v22 }
 0x243   : > { %v849_v37 = vpop.permute.xlu0 %848 }
 0x244   : > { %v895_v50 = vrot.slane %v849_v37, %v3172_v22 }
 0x247   : > { %v853_v47 = vpop.permute.xlu0 %852  ;;  %v851_v51 = vpop.permute.xlu1 %850 }
 0x248   : > { %v903_v52 = vrot.slane %v853_v47, %v3172_v22  ;;  %v869_v56 = vrot.slane %v851_v51, %v3172_v22  ;;  %v809_v47 = vcombine.low %v758_v61, %v774_v2  ;;  %v800_v61 = vcombine.low %v791_v58, %v799_v54 }
 0x24a   : > { %v904_v59 = vcombine.low %v895_v50, %v903_v52  ;;  %v905_v60 = vcombine.high %v895_v50, %v903_v52  ;;  %v870_v63 = vcombine.low %v861_v45, %v869_v56  ;;  %v871_v1 = vcombine.high %v861_v45, %v869_v56 }
 0x24b   : > { %v816_v56 = vrot.slane %v809_v47, %v3172_v22 }
 0x24c   : > { %v912_v5 = vrot.slane %v904_v59, %v3183_v28  ;;  %v919_v6 = vrot.slane %v905_v60, %v3183_v28  ;;  %v878_v10 = vrot.slane %v870_v63, %v3183_v28  ;;  %v885_v11 = vrot.slane %v871_v1, %v3183_v28 }
 0x24d   : > { %v825_v60 = vcombine.low %v816_v56, %v824_v36 }
 0x24e   : > { %v920_v15 = vcombine.high %v912_v5, %v2868_v39  ;;  %v921_v16 = vcombine.high %v919_v6, %v2868_v39  ;;  %v927_v17 = vshrl.u32 %v912_v5, 16  ;;  %v943_v18 = vshrl.u32 %v919_v6, 16 }
 0x24f   : > { %v886_v20 = vcombine.high %v878_v10, %v2868_v39  ;;  %v887_v21 = vcombine.high %v885_v11, %v2868_v39  ;;  %v926_v23 = vshrl.u32 %v878_v10, 16  ;;  %v942_v24 = vshrl.u32 %v885_v11, 16 }
 0x250   : > { %v924_v25 = vpack.i.b16 %v912_v5, %v878_v10  ;;  %v935_v26 = vshrl.u32 %v920_v15, 16  ;;  %v940_v27 = vpack.i.b16 %v919_v6, %v885_v11  ;;  %v951_v29 = vshrl.u32 %v921_v16, 16 }
 0x251   : > { %v934_v30 = vshrl.u32 %v886_v20, 16  ;;  %v950_v31 = vshrl.u32 %v887_v21, 16  ;;  %v928_v32 = vpack.i.b16 %v927_v17, %v926_v23  ;;  %v932_v33 = vpack.i.b16 %v920_v15, %v886_v20 }
 0x252   : > { %v944_v37 = vpack.i.b16 %v943_v18, %v942_v24  ;;  %v948_v38 = vpack.i.b16 %v921_v16, %v887_v21  ;;  %v954_v40 = vcombine.low %v924_v25, %v940_v27  ;;  %v832_v6 = vrot.slane %v825_v60, %v3183_v28 }
 0x253   : > { %v936_v41 = vpack.i.b16 %v935_v26, %v934_v30  ;;  %v952_v42 = vpack.i.b16 %v951_v29, %v950_v31  ;;  %v807_v10 = vrot.slane %v800_v61, %v3183_v28 }
 0x254   : > { %v962_v45 = vcombine.low %v932_v33, %v948_v38  ;;  %v979_v46 = vcombine.low %v928_v32, %v944_v37  ;;  %v961_v50 = vrot.slane %v954_v40, %v3172_v22  ;;  %v838_v16 = vshrl.u32 %v832_v6, 16  ;;  %v606_v33 = vld [vmem:[%s3103_s3] sm:$0x1] }
 0x255   : > { %v987_v48 = vcombine.low %v936_v41, %v952_v42  ;;  %v836_v18 = vpack.i.b16 %v832_v6, %v807_v10  ;;  %v837_v20 = vshrl.u32 %v807_v10, 16  ;;  %v833_v25 = vcombine.high %v832_v6, %v2868_v39 }
 0x256   : > { %v969_v51 = vrot.slane %v962_v45, %v3172_v22  ;;  %v986_v52 = vrot.slane %v979_v46, %v3172_v22  ;;  %v808_v27 = vcombine.high %v807_v10, %v2868_v39  ;;  %vm607_vm3 = vcmp.eq.f32.partialorder %v606_v33, 0.0 }
 0x257   : > { %v994_v35 = vrot.slane %v987_v48, %v3172_v22  ;;  %v839_v24 = vpack.i.b16 %v838_v16, %v837_v20  ;;  %v844_v29 = vshrl.u32 %v833_v25, 16  ;;  %v1371_v37 = vsel %vm607_vm3, 1, %v2868_v39 }
 0x258   : > { %v970_v53 = vcombine.low %v961_v50, %v969_v51  ;;  %v842_v30 = vpack.i.b16 %v833_v25, %v808_v27  ;;  %v843_v31 = vshrl.u32 %v808_v27, 16  ;;  %v1375_v38 = vrot.slane %v1371_v37, %v1374_v34 }
 0x259   : > { %v995_v55 = vcombine.low %v986_v52, %v994_v35 }
 0x25a   : > { %v977_v57 = vrot.slane %v970_v53, %v3183_v28  ;;  %v845_v32 = vpack.i.b16 %v844_v29, %v843_v31  ;;  %vm1376_vm4 = vcmp.eq.s32.totalorder %v1375_v38, 1 }
 0x25b   : > { %v1002_v59 = vrot.slane %v995_v55, %v3183_v28 }
 0x25c   : > { %v1007_v63 = vshrl.u32 %v977_v57, 16  ;;  %v978_v7 = vcombine.high %v977_v57, %v2868_v39 }
 0x25d   : > { %v1006_v62 = vpack.i.b16 %v1002_v59, %v977_v57  ;;  %v1008_v1 = vshrl.u32 %v1002_v59, 16  ;;  %v1003_v2 = vcombine.high %v1002_v59, %v2868_v39 }
 0x25e   : > { %v1013_v17 = vshrl.u32 %v978_v7, 16 }
 0x25f   : > { %v1191_v4 = vsel %vm1186_vm2, %v1006_v62, 0  ;;  %v1009_v5 = vpack.i.b16 %v1008_v1, %v1007_v63  ;;  %v1014_v11 = vshrl.u32 %v1003_v2, 16  ;;  %v1012_v15 = vpack.i.b16 %v1003_v2, %v978_v7 }
 0x260   : > { %2328 = vmatpush3.bf16.xpose.msra.mxu1 %v1191_v4 }
 0x261   : > { %v1237_v8 = vsel %vm1186_vm2, %v1009_v5, 0  ;;  %2339 = vmatprep.subr.bf16.mxu1 %v2860_v0  ;;  %v1015_v21 = vpack.i.b16 %v1014_v11, %v1013_v17  ;;  %v1283_v23 = vsel %vm1186_vm2, %v1012_v15, 0 }
 0x262   : > { %2334 = vmatpush3.bf16.xpose.msra.mxu0 %v1237_v8 }
 0x263   : > { %2345 = vmatprep.subr.bf16.mxu0 %v2860_v0  ;;  %v1329_v26 = vsel %vm1186_vm2, %v1015_v21, 0 }
 0x267   : > { %2330 = vmatmul.mubr.msk.bf16.vlgmr.msra.gmra.mxu1 %vm1186_vm2, %v836_v18 }
 0x268   : > { %2340 = vmatpush3.bf16.xpose.msra.mxu1 %v1283_v23  ;;  %2341 = vmatprep.mubr.msk.bf16.mxu1 %vm2861_vm0, %v2860_v0 }
 0x269   : > { %2336 = vmatmul.mubr.msk.bf16.vlgmr.msra.gmra.mxu0 %vm1186_vm2, %v839_v24  ;;  %2351 = vmatprep.subr.bf16.mxu1 %v2860_v0 }
 0x26a   : > { %2346 = vmatpush3.bf16.xpose.msra.mxu0 %v1329_v26  ;;  %2347 = vmatprep.mubr.msk.bf16.mxu0 %vm2861_vm0, %v2860_v0 }
 0x26b   : > { %2357 = vmatprep.subr.bf16.mxu0 %v2860_v0 }
 0x26f   : > { %2342 = vmatmul.mubr.msk.bf16.vlgmr.msra.gmra.mxu1 %vm1186_vm2, %v842_v30 }
 0x270   : > { %2353 = vmatprep.mubr.msk.bf16.mxu1 %vm2861_vm0, %v2860_v0 }
 0x271   : > { %2348 = vmatmul.mubr.msk.bf16.vlgmr.msra.gmra.mxu0 %vm1186_vm2, %v845_v32 }
 0x272   : > { %2359 = vmatprep.mubr.msk.bf16.mxu0 %vm2861_vm0, %v2860_v0 }
 0x327   : > { %v1227_v40 = vpop.f32.mrf.mxu1 }
 0x328   : > { %v1377_v41 = vsel %vm1376_vm4, -3.4028235e+38, %v1227_v40 }
 0x329   : > { %v2331_v42 = vpop.f32.mrf.mxu1  ;;  %v1273_v43 = vpop.f32.mrf.mxu0  ;;  %v1381_v44 = vsel %vm1186_vm2, %v1377_v41, -inf }
 0x32a   : > { %v1378_v45 = vsel %vm1376_vm4, -3.4028235e+38, %v1273_v43  ;;  %1382 = vmax.xlane.f32.xlu1 %v1381_v44 }
 0x32b   : > { %v1230_v46 = vpop.f32.mrf.mxu1  ;;  %v2337_v47 = vpop.f32.mrf.mxu0  ;;  %v1384_v48 = vsel %vm1186_vm2, %v1378_v45, -inf }
 0x32c   : > { %1385 = vmax.xlane.f32.xlu0 %v1384_v48 }
 0x32d   : > { %v2332_v19 = vpop.f32.mrf.mxu1  ;;  %v1276_v49 = vpop.f32.mrf.mxu0 }
 0x32f   : > { %v2338_v50 = vpop.f32.mrf.mxu0  ;;  %v1319_v51 = vpop.f32.mrf.mxu1 }
 0x330   : > { %v1379_v52 = vsel %vm1376_vm4, -3.4028235e+38, %v1319_v51 }
 0x331   : > { %v2343_v35 = vpop.f32.mrf.mxu1  ;;  %v1365_v36 = vpop.f32.mrf.mxu0  ;;  %v1387_v53 = vsel %vm1186_vm2, %v1379_v52, -inf }
 0x332   : > { %v1380_v54 = vsel %vm1376_vm4, -3.4028235e+38, %v1365_v36  ;;  %1388 = vmax.xlane.f32.xlu0 %v1387_v53 }
 0x333   : > { %v1322_v55 = vpop.f32.mrf.mxu1  ;;  %v2349_v56 = vpop.f32.mrf.mxu0  ;;  %v1390_v57 = vsel %vm1186_vm2, %v1380_v54, -inf }
 0x334   : > { %1391 = vmax.xlane.f32.xlu1 %v1390_v57 }
 0x335   : > { %v2344_v58 = vpop.f32.mrf.mxu1  ;;  %v1368_v59 = vpop.f32.mrf.mxu0 }
 0x337   : > { %v2350_v60 = vpop.f32.mrf.mxu0 }
 0x345   : > { %1018 = vrot.lane.b32.xlu1 %v3160_v12, %s2869_s23 }
 0x348   : > { %1016 = vrot.lane.b32.xlu0 %v3154_v9, %s2869_s23 }
 0x3b3   : > { %v1383_v61 = vpop.xlane.xlu1 %1382 }
 0x3b4   : > { %v1393_v62 = vsub.f32 %v1377_v41, %v1383_v61 }
 0x3b5   : > { %v1386_v63 = vpop.xlane.xlu0 %1385 }
 0x3b6   : > { %v1397_v1 = vmul.f32 1.442695, %v1393_v62  ;;  %v1394_v2 = vsub.f32 %v1378_v45, %v1386_v63 }
 0x3b8   : > { %2552 = vpow2.f32 %v1397_v1  ;;  %v1399_v4 = vmul.f32 1.442695, %v1394_v2 }
 0x3ba   : > { %2554 = vpow2.f32 %v1399_v4 }
 0x3bb   : > { %v1389_v8 = vpop.xlane.xlu0 %1388 }
 0x3bc   : > { %v1395_v11 = vsub.f32 %v1379_v52, %v1389_v8 }
 0x3bd   : > { %v1392_v9 = vpop.xlane.xlu1 %1391 }
 0x3be   : > { %v1396_v10 = vsub.f32 %v1380_v54, %v1392_v9  ;;  %v1401_v16 = vmul.f32 1.442695, %v1395_v11 }
 0x3c0   : > { %v1403_v15 = vmul.f32 1.442695, %v1396_v10 }
 0x3c1   : > { %v1019_v21 = vpop.permute.xlu1 %1018 }
 0x3c2   : > { %2556 = vpow2.f32 %v1403_v15  ;;  %v1065_v26 = vrot.slane %v1019_v21, %v3172_v22 }
 0x3c3   : > { %2558 = vpow2.f32 %v1401_v16 }
 0x3c5   : > { %v3274_v5 = vpop.eup %2552 }
 0x3c6   : > { %v1405_v6 = vsel %vm1186_vm2, %v3274_v5, 0.0 }
 0x3c7   : > { %v3278_v7 = vpop.eup %2554  ;;  %1406 = vadd.xlane.f32.xlu0 %v1405_v6 }
 0x3c8   : > { %v1408_v12 = vsel %vm1186_vm2, %v3278_v7, 0.0 }
 0x3c9   : > { %1409 = vadd.xlane.f32.xlu1 %v1408_v12 }
 0x3cf   : > { %v3284_v17 = vpop.eup %2556 }
 0x3d0   : > { %v3286_v18 = vpop.eup %2558  ;;  %v1414_v20 = vsel %vm1186_vm2, %v3284_v17, 0.0 }
 0x3da   : > { %1020 = vrot.lane.b32.xlu1 %v3165_v14, %s2869_s23  ;;  %v1411_v14 = vsel %vm1186_vm2, %v3286_v18, 0.0 }
 0x3dd   : > { %1022 = vrot.lane.b32.xlu0 %v3163_v13, %s2869_s23  ;;  %v1017_v13 = vpop.permute.xlu0 %1016 }
 0x3de   : > { %v1031_v30 = vrot.slane %v1017_v13, %v3172_v22 }
 0x3fc   : > { %1415 = vadd.xlane.f32.xlu0 %v1414_v20 }
 0x3fe   : > { %1412 = vadd.xlane.f32.xlu1 %v1411_v14 }
 0x450   : > { %v1407_v23 = vpop.xlane.xlu0 %1406 }
 0x451   : > { %2560 = vrcp.f32 %v1407_v23 }
 0x452   : > { %v1410_v24 = vpop.xlane.xlu1 %1409 }
 0x453   : > { %2562 = vrcp.f32 %v1410_v24 }
 0x454   : > { %v1023_v25 = vpop.permute.xlu0 %1022 }
 0x455   : > { %v1073_v27 = vrot.slane %v1023_v25, %v3172_v22 }
 0x456   : > { %v1021_v29 = vpop.permute.xlu1 %1020 }
 0x457   : > { %v1074_v31 = vcombine.low %v1065_v26, %v1073_v27  ;;  %v1075_v32 = vcombine.high %v1065_v26, %v1073_v27  ;;  %v1039_v33 = vrot.slane %v1021_v29, %v3172_v22 }
 0x459   : > { %v1082_v34 = vrot.slane %v1074_v31, %v3183_v28  ;;  %v1089_v37 = vrot.slane %v1075_v32, %v3183_v28  ;;  %v1040_v38 = vcombine.low %v1031_v30, %v1039_v33  ;;  %v1041_v40 = vcombine.high %v1031_v30, %v1039_v33 }
 0x45b   : > { %v1090_v41 = vcombine.high %v1082_v34, %v2868_v39  ;;  %v1048_v42 = vrot.slane %v1040_v38, %v3183_v28  ;;  %v1055_v43 = vrot.slane %v1041_v40, %v3183_v28  ;;  %v1091_v44 = vcombine.high %v1089_v37, %v2868_v39 }
 0x45c   : > { %v1097_v45 = vshrl.u32 %v1082_v34, 16  ;;  %v1113_v50 = vshrl.u32 %v1089_v37, 16 }
 0x45d   : > { %v1056_v46 = vcombine.high %v1048_v42, %v2868_v39  ;;  %v1057_v47 = vcombine.high %v1055_v43, %v2868_v39  ;;  %v1094_v48 = vpack.i.b16 %v1082_v34, %v1048_v42  ;;  %v1096_v19 = vshrl.u32 %v1048_v42, 16 }
 0x45e   : > { %v1105_v49 = vshrl.u32 %v1090_v41, 16  ;;  %v1110_v51 = vpack.i.b16 %v1089_v37, %v1055_v43  ;;  %v1112_v52 = vshrl.u32 %v1055_v43, 16  ;;  %v1121_v55 = vshrl.u32 %v1091_v44, 16  ;;  %v2561_v8 = vpop.eup %2560 }
 0x45f   : > { %v1098_v35 = vpack.i.b16 %v1097_v45, %v1096_v19  ;;  %v1102_v36 = vpack.i.b16 %v1090_v41, %v1056_v46  ;;  %v1104_v53 = vshrl.u32 %v1056_v46, 16  ;;  %v1118_v54 = vpack.i.b16 %v1091_v44, %v1057_v47  ;;  %v2544_v46 = vld [vmem:[%s3425_s4 + $0x8] sm:$0xff]  }
 0x460   : > { %v1114_v56 = vpack.i.b16 %v1113_v50, %v1112_v52  ;;  %v1120_v57 = vshrl.u32 %v1057_v47, 16  ;;  %v1124_v58 = vcombine.low %v1094_v48, %v1110_v51  ;;  %v2563_v11 = vpop.eup %2562  ;;  %v1421_v20 = vmul.f32 %v2561_v8, %v3274_v5 }
 0x461   : > { %v1106_v59 = vpack.i.b16 %v1105_v49, %v1104_v53  ;;  %v1132_v60 = vcombine.low %v1102_v36, %v1118_v54  ;;  %v1422_v24 = vmul.f32 %v2563_v11, %v3278_v7 }
 0x462   : > { %v1122_v61 = vpack.i.b16 %v1121_v55, %v1120_v57  ;;  %v1149_v62 = vcombine.low %v1098_v35, %v1114_v56  ;;  %v1131_v63 = vrot.slane %v1124_v58, %v3172_v22  ;;  %v1425_v32 = vpack.c.bf16 %v1421_v20, %v1421_v20 }
 0x463   : > { %v1139_v1 = vrot.slane %v1132_v60, %v3172_v22  ;;  %v1426_v34 = vpack.c.bf16 %v1422_v24, %v1422_v24 }
 0x464   : > { %v1157_v2 = vcombine.low %v1106_v59, %v1122_v61  ;;  %v1156_v6 = vrot.slane %v1149_v62, %v3172_v22 }
 0x465   : > { %v1140_v4 = vcombine.low %v1131_v63, %v1139_v1 }
 0x466   : > { %v1164_v12 = vrot.slane %v1157_v2, %v3172_v22 }
 0x467   : > { %v1147_v9 = vrot.slane %v1140_v4, %v3183_v28 }
 0x468   : > { %v1165_v10 = vcombine.low %v1156_v6, %v1164_v12 }
 0x469   : > { %v1148_v15 = vcombine.high %v1147_v9, %v2868_v39  ;;  %v1177_v13 = vshrl.u32 %v1147_v9, 16 }
 0x46a   : > { %v1172_v16 = vrot.slane %v1165_v10, %v3183_v28 }
 0x46b   : > { %v1183_v25 = vshrl.u32 %v1148_v15, 16 }
 0x46c   : > { %v1176_v14 = vpack.i.b16 %v1172_v16, %v1147_v9  ;;  %v1178_v21 = vshrl.u32 %v1172_v16, 16  ;;  %v1173_v23 = vcombine.high %v1172_v16, %v2868_v39 }
 0x46e   : > { %v1434_v26 = vsel %vm1432_vm5, %v1176_v14, 0  ;;  %v1179_v27 = vpack.i.b16 %v1178_v21, %v1177_v13  ;;  %v1182_v29 = vpack.i.b16 %v1173_v23, %v1148_v15  ;;  %v1184_v30 = vshrl.u32 %v1173_v23, 16 }
 0x46f   : > { %2352 = vmatpush3.bf16.msra.mxu1 %v1434_v26 }
 0x470   : > { %v1480_v31 = vsel %vm1432_vm5, %v1179_v27, 0  ;;  %2363 = vmatprep.subr.bf16.mxu1 %v2860_v0  ;;  %v1185_v5 = vpack.i.b16 %v1184_v30, %v1183_v25  ;;  %v1526_v33 = vsel %vm1432_vm5, %v1182_v29, 0 }
 0x471   : > { %2358 = vmatpush3.bf16.msra.mxu0 %v1480_v31 }
 0x472   : > { %2354 = vmatmul.mubr.msk.bf16.vlgmr.msra.gmra.mxu1 %vm1186_vm2, %v1425_v32  ;;  %2369 = vmatprep.subr.bf16.mxu0 %v2860_v0  ;;  %v1572_v7 = vsel %vm1432_vm5, %v1185_v5, 0 }
 0x473   : > { %2364 = vmatpush3.bf16.msra.mxu1 %v1526_v33  ;;  %2365 = vmatprep.mubr.msk.bf16.mxu1 %vm2861_vm0, %v2860_v0 }
 0x474   : > { %2360 = vmatmul.mubr.msk.bf16.vlgmr.msra.gmra.mxu0 %vm1186_vm2, %v1426_v34  ;;  %2375 = vmatprep.subr.bf16.mxu1 %v2860_v0 }
 0x475   : > { %2370 = vmatpush3.bf16.msra.mxu0 %v1572_v7  ;;  %2371 = vmatprep.mubr.msk.bf16.mxu0 %vm2861_vm0, %v2860_v0 }
 0x476   : > { %2383 = vmatprep.subr.bf16.mxu0 %v2860_v0 }
 0x485   : > { %v1416_v37 = vpop.xlane.xlu0 %1415 }
 0x486   : > { %2564 = vrcp.f32 %v1416_v37 }
 0x487   : > { %v1413_v38 = vpop.xlane.xlu1 %1412 }
 0x488   : > { %2566 = vrcp.f32 %v1413_v38 }
 0x493   : > { %v2565_v40 = vpop.eup %2564 }
 0x494   : > { %v1424_v41 = vmul.f32 %v2565_v40, %v3284_v17 }
 0x495   : > { %v2567_v42 = vpop.eup %2566 }
 0x496   : > { %v1428_v43 = vpack.c.bf16 %v1424_v41, %v1424_v41  ;;  %v1423_v44 = vmul.f32 %v2567_v42, %v3286_v18 }
 0x498   : > { %2372 = vmatmul.mubr.msk.bf16.vlgmr.msra.gmra.mxu0 %vm1186_vm2, %v1428_v43  ;;  %v1427_v45 = vpack.c.bf16 %v1423_v44, %v1423_v44 }
 0x499   : > { %2387 = vmatprep.mubr.msk.bf16.mxu0 %vm2861_vm0, %v2860_v0 }
 0x49a   : > { %2366 = vmatmul.mubr.msk.bf16.vlgmr.msra.gmra.mxu1 %vm1186_vm2, %v1427_v45  ;;  %v2545_v45 = vld [vmem:[%s3425_s4] sm:$0xff]  }
 0x49b   : > { %2379 = vmatprep.mubr.msk.bf16.mxu1 %vm2861_vm0, %v2860_v0  ;;  %2376 = vmatpush3.bf16.msra.mxu1 %v2544_v46 }
 0x49c   : > { %2377 = vmatprep.subr.bf16.mxu1 %v2860_v0 }
 0x49f   : > { %2378 = vmatpush3.bf16.msra.mxu1 %v2545_v45 }
 0x4a0   : > { %2391 = vmatprep.subr.bf16.mxu1 %v2860_v0 }
 0x532   : > { %v1470_v17 = vpop.f32.mrf.mxu1 }
 0x533   : > { %v1614_v36 = vpack.c.bf16 %v1470_v17, %v1470_v17 }
 0x534   : > { %v2355_v18 = vpop.f32.mrf.mxu1  ;;  %v1516_v47 = vpop.f32.mrf.mxu0 }
 0x535   : > { %v1648_v52 = vpack.c.bf16 %v1516_v47, %v1516_v47  ;;  %v1621_v61 = vrot.slane %v1614_v36, %v3172_v22 }
 0x536   : > { %v1473_v48 = vpop.f32.mrf.mxu1  ;;  %v2361_v19 = vpop.f32.mrf.mxu0 }
 0x537   : > { %v1655_v56 = vrot.slane %v1648_v52, %v3172_v22 }
 0x538   : > { %v2356_v49 = vpop.f32.mrf.mxu1  ;;  %v1519_v50 = vpop.f32.mrf.mxu0 }
 0x53a   : > { %v2362_v51 = vpop.f32.mrf.mxu0 }
 0x558   : > { %v1608_v35 = vpop.f32.mrf.mxu0 }
 0x559   : > { %v1656_v53 = vpack.c.bf16 %v1608_v35, %v1608_v35 }
 0x55a   : > { %v1562_v54 = vpop.f32.mrf.mxu1  ;;  %v2373_v55 = vpop.f32.mrf.mxu0 }
 0x55b   : > { %v1663_v57 = vrot.slane %v1656_v53, %v3172_v22  ;;  %v1622_v58 = vpack.c.bf16 %v1562_v54, %v1562_v54 }
 0x55c   : > { %v2367_v59 = vpop.f32.mrf.mxu1  ;;  %v1611_v60 = vpop.f32.mrf.mxu0 }
 0x55d   : > { %v1664_v62 = vcombine.low %v1655_v56, %v1663_v57  ;;  %v1665_v63 = vcombine.high %v1655_v56, %v1663_v57  ;;  %v1629_v1 = vrot.slane %v1622_v58, %v3172_v22 }
 0x55e   : > { %v1565_v2 = vpop.f32.mrf.mxu1  ;;  %v2374_v4 = vpop.f32.mrf.mxu0 }
 0x55f   : > { %v1672_v6 = vrot.slane %v1664_v62, %v3183_v28  ;;  %v1679_v12 = vrot.slane %v1665_v63, %v3183_v28  ;;  %v1630_v9 = vcombine.low %v1621_v61, %v1629_v1  ;;  %v1631_v8 = vcombine.high %v1621_v61, %v1629_v1  ;;  %v2269_v61 = vld [vmem:[#allocation6] ss:$0 sm:$0xff] }
 0x560   : > { %v2368_v10 = vpop.f32.mrf.mxu1 }
 0x561   : > { %v1680_v11 = vcombine.high %v1672_v6, %v2868_v39  ;;  %v1638_v15 = vrot.slane %v1630_v9, %v3183_v28  ;;  %v1645_v16 = vrot.slane %v1631_v8, %v3183_v28  ;;  %v1681_v20 = vcombine.high %v1679_v12, %v2868_v39 }
 0x562   : > { %v1687_v14 = vshrl.u32 %v1672_v6, 16  ;;  %v1703_v26 = vshrl.u32 %v1679_v12, 16 }
 0x563   : > { %v1646_v13 = vcombine.high %v1638_v15, %v2868_v39  ;;  %v1647_v21 = vcombine.high %v1645_v16, %v2868_v39  ;;  %v1684_v23 = vpack.i.b16 %v1672_v6, %v1638_v15  ;;  %v1686_v24 = vshrl.u32 %v1638_v15, 16 }
 0x564   : > { %v1695_v25 = vshrl.u32 %v1680_v11, 16  ;;  %v1700_v27 = vpack.i.b16 %v1679_v12, %v1645_v16  ;;  %v1702_v29 = vshrl.u32 %v1645_v16, 16  ;;  %v1711_v33 = vshrl.u32 %v1681_v20, 16  ;;  %v2546_v16 = vld [vmem:[%s3429_s8 + $0x8] sm:$0xff]  }
 0x565   : > { %v1688_v30 = vpack.i.b16 %v1687_v14, %v1686_v24  ;;  %v1692_v31 = vpack.i.b16 %v1680_v11, %v1646_v13  ;;  %v1694_v32 = vshrl.u32 %v1646_v13, 16  ;;  %v1708_v5 = vpack.i.b16 %v1681_v20, %v1647_v21  ;;  %2384 = vmatpush3.bf16.msra.mxu0 %v2546_v16 }
 0x566   : > { %v1704_v34 = vpack.i.b16 %v1703_v26, %v1702_v29  ;;  %v1710_v7 = vshrl.u32 %v1647_v21, 16  ;;  %v1714_v37 = vcombine.low %v1684_v23, %v1700_v27  ;;  %2385 = vmatprep.subr.bf16.mxu0 %v2860_v0  ;;  %v2273_v23 = vld [vmem:[#allocation7] ss:$0 sm:$0xff] }
 0x567   : > { %v1696_v38 = vpack.i.b16 %v1695_v25, %v1694_v32  ;;  %v1722_v40 = vcombine.low %v1692_v31, %v1708_v5  ;;  %v2274_v25 = vld [vmem:[#allocation9] ss:$0 sm:$0xff]  ;;  %v2549_v31 = vld [vmem:[%s3461_s28 + $0x10] sm:$0xff]   ;;  %v2551_v5 = vld [vmem:[%s3461_s28] sm:$0xff]  }
 0x568   : > { %v1712_v41 = vpack.i.b16 %v1711_v33, %v1710_v7  ;;  %v1739_v42 = vcombine.low %v1688_v30, %v1704_v34  ;;  %v1721_v43 = vrot.slane %v1714_v37, %v3172_v22  ;;  %v2548_v30 = vld [vmem:[%s3461_s28 + $0x18] sm:$0xff]   ;;  %v2550_v32 = vld [vmem:[%s3461_s28 + $0x8] sm:$0xff]  }
 0x569   : > { %v1729_v44 = vrot.slane %v1722_v40, %v3172_v22  ;;  %v2275_v33 = vld [vmem:[#allocation10] ss:$0 sm:$0xff] }
 0x56a   : > { %v1747_v46 = vcombine.low %v1696_v38, %v1712_v41  ;;  %v1746_v18 = vrot.slane %v1739_v42, %v3172_v22 }
 0x56b   : > { %v1730_v17 = vcombine.low %v1721_v43, %v1729_v44 }
 0x56c   : > { %v1754_v47 = vrot.slane %v1747_v46, %v3172_v22 }
 0x56d   : > { %v1737_v48 = vrot.slane %v1730_v17, %v3183_v28 }
 0x56e   : > { %v1755_v19 = vcombine.low %v1746_v18, %v1754_v47 }
 0x56f   : > { %v1767_v50 = vshrl.u32 %v1737_v48, 16  ;;  %v1738_v52 = vcombine.high %v1737_v48, %v2868_v39 }
 0x570   : > { %v1762_v49 = vrot.slane %v1755_v19, %v3183_v28 }
 0x571   : > { %v1773_v22 = vshrl.u32 %v1738_v52, 16 }
 0x572   : > { %v1768_v51 = vshrl.u32 %v1762_v49, 16  ;;  %v1763_v35 = vcombine.high %v1762_v49, %v2868_v39  ;;  %v1766_v36 = vpack.i.b16 %v1762_v49, %v1737_v48 }
 0x574   : > { %v1769_v53 = vpack.i.b16 %v1768_v51, %v1767_v50  ;;  %v1772_v54 = vpack.i.b16 %v1763_v35, %v1738_v52  ;;  %v1774_v55 = vshrl.u32 %v1763_v35, 16 }
 0x576   : > { %1776 = vrot.lane.b32.xlu0 %v1769_v53, %s2870_s6  ;;  %1778 = vrot.lane.b32.xlu1 %v1772_v54, %s2871_s7  ;;  %v1775_v56 = vpack.i.b16 %v1774_v55, %v1773_v22 }
 0x57a   : > { %1780 = vrot.lane.b32.xlu1 %v1775_v56, %s2872_s20  ;;  %s3462_s20 = sld [smem:[#allocation25_spill]] }
 0x5e8   : > { %v1777_v57 = vpop.permute.xlu0 %1776  ;;  %v1779_v28 = vpop.permute.xlu1 %1778 }
 0x5e9   : > { %v1784_v58 = vsel %vm1186_vm2, %v1766_v36, %v1777_v57  ;;  %v2285_v57 = vld [vmem:[%s3462_s20] ss:$0 sm:$0xff] }
 0x5ea   : > { %v1787_v59 = vsel %vm1785_vm6, %v1784_v58, %v1779_v28  ;;  %v2286_v58 = vld [vmem:[#allocation13] ss:$0 sm:$0xff] }
 0x5ec   : > { %v1781_v39 = vpop.permute.xlu1 %1780 }
 0x5ed   : > { %v1790_v60 = vsel %vm1788_vm7, %v1787_v59, %v1781_v39 }
 0x5ee   : > { %2380 = vmatmul.mubr.msk.bf16.vlgmr.msra.gmra.mxu1 %vm633_vm1, %v1790_v60 }
 0x5ef   : > { %2399 = vmatprep.mubr.msk.bf16.mxu1 %vm2861_vm0, %v2860_v0  ;;  %2392 = vmatpush3.bf16.msra.mxu1 %v2548_v30 }
 0x5f0   : > { %2393 = vmatprep.subr.bf16.mxu1 %v2860_v0 }
 0x5f3   : > { %2394 = vmatpush3.bf16.msra.mxu1 %v2549_v31 }
 0x5f4   : > { %2395 = vmatprep.subr.bf16.mxu1 %v2860_v0 }
 0x5f7   : > { %2396 = vmatpush3.bf16.msra.mxu1 %v2550_v32 }
 0x5f8   : > { %2397 = vmatprep.subr.bf16.mxu1 %v2860_v0  ;;  %v2279_v0 = vld [vmem:[#allocation12] ss:$0 sm:$0xff] }
 0x5fb   : > { %2398 = vmatpush3.bf16.msra.mxu1 %v2551_v5 }
 0x6ae   : > { %v1850_v62 = vpop.f32.mrf.mxu1 }
 0x6af   : > { %v1851_v63 = vadd.f32 %v2269_v61, %v1850_v62 }
 0x6b0   : > { %v2381_v1 = vpop.f32.mrf.mxu1 }
 0x6b1   : > { %v1856_v2 = vadd.f32 %v1851_v63, %v3145_v3  ;;  %v2547_v3 = vld [vmem:[%s3429_s8] sm:$0xff]  }
 0x6b2   : > { %v1853_v4 = vpop.f32.mrf.mxu1  ;;  %2386 = vmatpush3.bf16.msra.mxu0 %v2547_v3 }
 0x6b3   : > { %v1859_v6 = vsel %vm633_vm1, %v1856_v2, 0.0 }
 0x6b4   : > { %1860 = vadd.xlane.f32.xlu0 %v1859_v6  ;;  %v2382_v12 = vpop.f32.mrf.mxu1 }
 0x73d   : > { %v1861_v9 = vpop.xlane.xlu0 %1860 }
 0x73e   : > { %v1863_v8 = vmul.f32 0.03125, %v1861_v9 }
 0x740   : > { %v1864_v10 = vsub.f32 %v1856_v2, %v1863_v8 }
 0x742   : > { %v1865_v11 = vmul.f32 %v1864_v10, %v1864_v10 }
 0x744   : > { %v1866_v15 = vsel %vm633_vm1, %v1865_v11, 0.0 }
 0x745   : > { %1867 = vadd.xlane.f32.xlu1 %v1866_v15 }
 0x7ce   : > { %v1868_v20 = vpop.xlane.xlu1 %1867 }
 0x7cf   : > { %v1869_v14 = vmul.f32 0.03125, %v1868_v20 }
 0x7d1   : > { %v1870_v13 = vadd.f32 1e-12, %v1869_v14 }
 0x7d3   : > { %2568 = vrsqrt.f32 %v1870_v13 }
 0x7e0   : > { %v2569_v21 = vpop.eup %2568 }
 0x7e1   : > { %v1872_v24 = vmul.f32 %v2569_v21, %v1864_v10 }
 0x7e3   : > { %v1879_v26 = vmul.f32 %v2273_v23, %v1872_v24 }
 0x7e5   : > { %v1886_v27 = vadd.f32 %v2274_v25, %v1879_v26 }
 0x7e7   : > { %v1887_v29 = vpack.c.bf16 %v1886_v27, %v1886_v27 }
 0x7e9   : > { %2388 = vmatmul.mubr.msk.bf16.vlgmr.msra.gmra.mxu0 %vm633_vm1, %v1887_v29 }
 0x8a9   : > { %v1948_v34 = vpop.f32.mrf.mxu0 }
 0x8aa   : > { %v1949_v7 = vadd.f32 %v2275_v33, %v1948_v34 }
 0x8ab   : > { %v2389_v37 = vpop.f32.mrf.mxu0 }
 0x8ac   : > { %v1955_v38 = vmul.f32 0.70710677, %v1949_v7  ;;  %v1954_v43 = vmul.f32 0.5, %v1949_v7 }
 0x8ad   : > { %v1951_v40 = vpop.f32.mrf.mxu0 }
 0x8ae   : > { %2570 = verf.f32 %v1955_v38 }
 0x8af   : > { %v2390_v41 = vpop.f32.mrf.mxu0 }
 0x8bb   : > { %v2571_v42 = vpop.eup %2570 }
 0x8bc   : > { %v1957_v44 = vadd.f32 1.0, %v2571_v42 }
 0x8be   : > { %v1958_v45 = vmul.f32 %v1957_v44, %v1954_v43 }
 0x8c0   : > { %v1959_v46 = vpack.c.bf16 %v1958_v45, %v1958_v45 }
 0x8c2   : > { %2400 = vmatmul.mubr.msk.bf16.vlgmr.msra.gmra.mxu1 %vm1999_vm8, %v1959_v46 }
 0x982   : > { %v2037_v17 = vpop.f32.mrf.mxu1 }
 0x983   : > { %v2038_v18 = vadd.f32 %v2279_v0, %v2037_v17 }
 0x984   : > { %v2401_v47 = vpop.f32.mrf.mxu1 }
 0x985   : > { %v2043_v48 = vadd.f32 %v2038_v18, %v1886_v27 }
 0x986   : > { %v2040_v19 = vpop.f32.mrf.mxu1 }
 0x987   : > { %v2046_v49 = vsel %vm633_vm1, %v2043_v48, 0.0 }
 0x988   : > { %2047 = vadd.xlane.f32.xlu0 %v2046_v49  ;;  %v2402_v50 = vpop.f32.mrf.mxu1 }
 0xa11   : > { %v2048_v51 = vpop.xlane.xlu0 %2047 }
 0xa12   : > { %v2049_v52 = vmul.f32 0.03125, %v2048_v51 }
 0xa14   : > { %v2050_v35 = vsub.f32 %v2043_v48, %v2049_v52 }
 0xa16   : > { %v2051_v36 = vmul.f32 %v2050_v35, %v2050_v35 }
 0xa18   : > { %v2052_v53 = vsel %vm633_vm1, %v2051_v36, 0.0 }
 0xa19   : > { %2053 = vadd.xlane.f32.xlu0 %v2052_v53 }
 0xaa2   : > { %v2054_v54 = vpop.xlane.xlu0 %2053 }
 0xaa3   : > { %v2055_v55 = vmul.f32 0.03125, %v2054_v54 }
 0xaa5   : > { %v2056_v22 = vadd.f32 1e-12, %v2055_v55 }
 0xaa7   : > { %2572 = vrsqrt.f32 %v2056_v22 }
 0xab4   : > { %v2573_v56 = vpop.eup %2572 }
 0xab5   : > { %v2058_v28 = vmul.f32 %v2573_v56, %v2050_v35 }
 0xab7   : > { %v2065_v59 = vmul.f32 %v2285_v57, %v2058_v28 }
 0xab9   : > { %v2072_v39 = vadd.f32 %v2286_v58, %v2065_v59 }
 0xabb   : > { %v2073_v60 = vpack.c.bf16 %v2072_v39, %v2072_v39 }
 0xabd   : > { %2075 = vst.msk [vmem:[%s604_s14] sm:$0xf] %vm2074_vm9, %v2073_v60 }
 0xabe PF: > { %s31_s18 = sadd.s32 1, %s2850_s18   ;;  %s3464_s29 = smov %s2834_s30 }
 0xabf   : > { %p28_p12 = scmp.ge.s32.totalorder %s31_s18, 4   ;;  %s3465_s30 = smov %s2838_s15 }
 0xac0   : > { %s3466_s15 = smov %s3085_s24  ;;  %s3467_s16 = smov %s2846_s17 }
 0xac1   : > { %s3468_s17 = smov %s3470_s19  ;;  %30 = sbr.rel (!%p28_p12) target bundleno = 16 (0x10), region = 147 }
 0xac6   :  { %2101 = vsyncpa [#allocation3], 1 }
 0xac7   :  { %2103 = vsyncpa [#allocation3 + $0x1], 1 }
 0xac8   :  { %2104 = vsyncpa [#allocation5], 1 }
 0xac9   :  { %2105 = vsyncpa [#allocation8], 1 }
 0xaca   :  { %2106 = vsyncpa [#allocation11], 1 }
 0xacb   :  { %2107 = vsyncpa [#allocation14], 1 }

</bundles_post_ra>
